<compile_context>
chip_gen: v5e
topology: v5e:2x2
jax: 0.10.0
libtpu: 0.0.40
codegen_flags: <defaults>
</compile_context>

<pallas_src>
import math
import functools

import jax
import jax.numpy as jnp
from jax.experimental import pallas as pl
from jax.experimental.pallas import tpu as pltpu


_VMEM_LIMIT = 32 * 1024 * 1024  # safe on v5e/v6e (128 MiB) and v7x (64 MiB physical)


# ----------------------------- Pallas kernels -----------------------------

def _qkv_kernel(x_ref, w_ref, b_ref, o_ref, *, compute_dtype):
    # x: (tm, D), w: (D, 3D), b: (1, 3D) -> o: (tm, 3D). f32 accumulation on the MXU.
    x = x_ref[...].astype(compute_dtype)
    w = w_ref[...].astype(compute_dtype)
    o_ref[...] = jnp.dot(x, w, preferred_element_type=jnp.float32) + b_ref[...]


def qkv_projection(x_flat, wqkv, bqkv, *, compute_dtype=jnp.float32, tm=256):
    M, K = x_flat.shape
    N = wqkv.shape[1]
    tm = min(tm, M)
    kern = functools.partial(_qkv_kernel, compute_dtype=compute_dtype)
    return pl.pallas_call(
        kern,
        out_shape=jax.ShapeDtypeStruct((M, N), jnp.float32),
        grid=(pl.cdiv(M, tm),),
        in_specs=[
            pl.BlockSpec((tm, K), lambda i: (i, 0)),
            pl.BlockSpec((K, N), lambda i: (0, 0)),   # weight resident across grid
            pl.BlockSpec((1, N), lambda i: (0, 0)),
        ],
        out_specs=pl.BlockSpec((tm, N), lambda i: (i, 0)),
        compiler_params=pltpu.CompilerParams(
            dimension_semantics=("parallel",),
            vmem_limit_bytes=_VMEM_LIMIT,
        ),
    )(x_flat, wqkv, bqkv.reshape(1, N))


def _attn_kernel(qT_ref, k_ref, v_ref, f_ref, o_ref, *, compute_dtype, approx_recip):
    # Per-batch slice, all heads at once:
    #   qT: (a_h, LR, HR)  (already transposed, scale folded into Wq)
    #   k, v: (a_h, HR, LR)
    #   f: (a_h, LR, R)
    #   out: (a_h, LR, HR)
    cd = compute_dtype
    qT = qT_ref[...].astype(cd)
    k = k_ref[...].astype(cd)
    v = v_ref[...].astype(cd)
    f = f_ref[...].astype(cd)

    # key/val: standard batched matmul (a,m,l)@(a,l,r)->(a,m,r)
    key = jnp.einsum("aml,alr->amr", k, f, preferred_element_type=jnp.float32)
    val = jnp.einsum("aml,alr->amr", v, f, preferred_element_type=jnp.float32)

    # scores: (a,l,m)@(a,m,r)->(a,l,r); 1/sqrt(head*rank) already folded into Wq/bq.
    scores = jnp.einsum("alm,amr->alr", qT, key.astype(cd),
                        preferred_element_type=jnp.float32)

    # softmax over R (f32 elementwise; EUP reciprocal)
    m = jnp.max(scores, axis=-1, keepdims=True)
    e = jnp.exp(scores - m)
    p = e * pl.reciprocal(jnp.sum(e, axis=-1, keepdims=True), approx=approx_recip)

    # attn: contract last dim of both (a,l,r)x(a,m,r)->(a,l,m)
    o_ref[...] = jnp.einsum("alr,amr->alm", p.astype(cd), val.astype(cd),
                            preferred_element_type=jnp.float32)


def attn_core(qT, k, v, factor, *, compute_dtype=jnp.float32):
    bs, a_h, LR, HR = qT.shape
    R = factor.shape[-1]
    approx = bool(jnp.dtype(compute_dtype) != jnp.dtype(jnp.float32))
    kern = functools.partial(_attn_kernel, compute_dtype=compute_dtype, approx_recip=approx)
    return pl.pallas_call(
        kern,
        out_shape=jax.ShapeDtypeStruct((bs, a_h, LR, HR), jnp.float32),
        grid=(bs,),
        in_specs=[
            pl.BlockSpec((None, a_h, LR, HR), lambda b: (b, 0, 0, 0)),
            pl.BlockSpec((None, a_h, HR, LR), lambda b: (b, 0, 0, 0)),
            pl.BlockSpec((None, a_h, HR, LR), lambda b: (b, 0, 0, 0)),
            pl.BlockSpec((a_h, LR, R), lambda b: (0, 0, 0)),  # factor resident (grid-invariant)
        ],
        out_specs=pl.BlockSpec((None, a_h, LR, HR), lambda b: (b, 0, 0, 0)),
        compiler_params=pltpu.CompilerParams(
            dimension_semantics=("parallel",),
            vmem_limit_bytes=_VMEM_LIMIT,
        ),
    )(qT, k, v, factor)


def _ffn_ln_kernel(a_ref, x_ref, w1_ref, b1_ref, w2_ref, b2_ref, g_ref, be_ref, o_ref,
                   *, compute_dtype):
    # a, x: (tm, D); w1: (D, H); w2: (H, D). Matmuls in compute_dtype, f32 accumulation,
    # LayerNorm elementwise math in f32 (v5e-safe).
    cd = compute_dtype
    a = a_ref[...]
    h = jnp.dot(a.astype(cd), w1_ref[...].astype(cd),
                preferred_element_type=jnp.float32) + b1_ref[...]
    h = jnp.maximum(h, 0.0)
    # Dropout(p) is identity in eval mode.
    ff = jnp.dot(h.astype(cd), w2_ref[...].astype(cd),
                 preferred_element_type=jnp.float32) + b2_ref[...]
    y = ff + x_ref[...]
    mu = jnp.mean(y, axis=-1, keepdims=True)
    d = y - mu
    var = jnp.mean(d * d, axis=-1, keepdims=True)
    o_ref[...] = d * jax.lax.rsqrt(var + 1e-5) * g_ref[...] + be_ref[...]


def ffn_layernorm(attn_flat, x_flat, w1, b1, w2, b2, gamma, beta,
                  *, compute_dtype=jnp.float32, tm=256):
    M, D = x_flat.shape
    H = w1.shape[1]
    tm = min(tm, M)
    kern = functools.partial(_ffn_ln_kernel, compute_dtype=compute_dtype)
    return pl.pallas_call(
        kern,
        out_shape=jax.ShapeDtypeStruct((M, D), jnp.float32),
        grid=(pl.cdiv(M, tm),),
        in_specs=[
            pl.BlockSpec((tm, D), lambda i: (i, 0)),
            pl.BlockSpec((tm, D), lambda i: (i, 0)),
            pl.BlockSpec((D, H), lambda i: (0, 0)),   # weights resident across grid
            pl.BlockSpec((1, H), lambda i: (0, 0)),
            pl.BlockSpec((H, D), lambda i: (0, 0)),
            pl.BlockSpec((1, D), lambda i: (0, 0)),
            pl.BlockSpec((1, D), lambda i: (0, 0)),
            pl.BlockSpec((1, D), lambda i: (0, 0)),
        ],
        out_specs=pl.BlockSpec((tm, D), lambda i: (i, 0)),
        compiler_params=pltpu.CompilerParams(
            dimension_semantics=("parallel",),
            vmem_limit_bytes=_VMEM_LIMIT,
        ),
    )(attn_flat, x_flat, w1, b1.reshape(1, H), w2, b2.reshape(1, D),
      gamma.reshape(1, D), beta.reshape(1, D))


# ------------------------------ model glue ------------------------------

def init_params(key, attn_dim, len_dim, head, rank):
    a_h = attn_dim // head
    l_r = len_dim // rank
    ks = jax.random.split(key, 8)

    def lin_init(k, in_f, out_f):
        kw, kb = jax.random.split(k)
        bound = 1.0 / math.sqrt(in_f)
        w = jax.random.uniform(kw, (in_f, out_f), jnp.float32, -bound, bound)
        b = jax.random.uniform(kb, (out_f,), jnp.float32, -bound, bound)
        return w, b

    wq, bq = lin_init(ks[0], attn_dim, attn_dim)
    wk, bk = lin_init(ks[1], attn_dim, attn_dim)
    wv, bv = lin_init(ks[2], attn_dim, attn_dim)
    # xavier_normal_ on (1, a_h, l_r, rank): fan_in = a_h*l_r*rank, fan_out = 1*l_r*rank
    std = math.sqrt(2.0 / ((a_h + 1) * l_r * rank))
    factor = std * jax.random.normal(ks[3], (1, a_h, l_r, rank), jnp.float32)
    w1, b1 = lin_init(ks[4], attn_dim, 2 * attn_dim)
    w2, b2 = lin_init(ks[5], 2 * attn_dim, attn_dim)
    gamma = jnp.ones((attn_dim,), jnp.float32)
    beta = jnp.zeros((attn_dim,), jnp.float32)
    return dict(
        wq=wq, bq=bq, wk=wk, bk=bk, wv=wv, bv=bv, factor=factor,
        w1=w1, b1=b1, w2=w2, b2=b2, gamma=gamma, beta=beta,
    )


def prepare_kernel_params(params, head, rank, *, compute_dtype=jnp.float32):
    """One-time param transform: fuse QKV weights, fold the attention scale into Wq/bq,
    squeeze the factor, and (optionally) pre-cast matmul weights to the compute dtype."""
    D = params["wq"].shape[0]
    a_h = D // head
    scale = 1.0 / math.sqrt(head * rank)
    wqkv = jnp.concatenate([params["wq"] * scale, params["wk"], params["wv"]], axis=1)  # (D, 3D)
    bqkv = jnp.concatenate([params["bq"] * scale, params["bk"], params["bv"]], axis=0)  # (3D,)
    cd = compute_dtype
    return dict(
        wqkv=wqkv.astype(cd),
        bqkv=bqkv,                                           # bias added to f32 accumulator
        factor=params["factor"].reshape(a_h, -1, rank),      # (a_h, l_r, rank)
        w1=params["w1"].astype(cd), b1=params["b1"],
        w2=params["w2"].astype(cd), b2=params["b2"],
        gamma=params["gamma"], beta=params["beta"],
    )


def block_self_forward(kp, x, head, rank, *, compute_dtype=jnp.float32):
    bs, S, D = x.shape                 # S == len_dim, D == attn_dim
    a_h = D // head
    l_r = S // rank
    HR = head * rank
    M = bs * S

    x_flat = x.reshape(M, D)

    # Fused Q/K/V projection: one row-tiled matmul against the (D, 3D) weight.
    qkv = qkv_projection(x_flat, kp["wqkv"], kp["bqkv"], compute_dtype=compute_dtype)  # (M, 3D)

    # PyTorch view: Linear(x) (bs, S, D) -> (bs, a_h, head*rank, l_r)
    q = qkv[:, :D].reshape(bs, a_h, HR, l_r)
    k = qkv[:, D:2 * D].reshape(bs, a_h, HR, l_r)
    v = qkv[:, 2 * D:].reshape(bs, a_h, HR, l_r)
    qT = jnp.swapaxes(q, -2, -1)       # (bs, a_h, l_r, HR) == query.transpose(-2, -1)

    # Attention core: one program per batch, all heads batched inside the kernel.
    attn = attn_core(qT, k, v, kp["factor"], compute_dtype=compute_dtype)  # (bs, a_h, l_r, HR)
    attn_flat = attn.reshape(M, D)     # == self_attn.view(bs, -1, attn_dim)

    # FFN + residual + LayerNorm (row-tiled, weights resident).
    out = ffn_layernorm(attn_flat, x_flat, kp["w1"], kp["b1"], kp["w2"], kp["b2"],
                        kp["gamma"], kp["beta"], compute_dtype=compute_dtype)
    return out.reshape(bs, S, D)


def reference_forward(params, x, head, rank):
    """Pure-JAX reference mirroring the PyTorch forward (eval mode)."""
    bs, S, D = x.shape
    a_h = D // head
    l_r = S // rank
    HR = head * rank
    lin = lambda t, w, b: t @ w + b
    q = lin(x, params["wq"], params["bq"]).reshape(bs, a_h, HR, l_r)
    k = lin(x, params["wk"], params["bk"]).reshape(bs, a_h, HR, l_r)
    v = lin(x, params["wv"], params["bv"]).reshape(bs, a_h, HR, l_r)
    f = params["factor"]
    key = jnp.matmul(k, f)
    val = jnp.matmul(v, f)
    scores = jnp.matmul(jnp.swapaxes(q, -2, -1), key) / math.sqrt(head * rank)
    p = jax.nn.softmax(scores, axis=-1)
    sa = jnp.matmul(p, jnp.swapaxes(val, -2, -1)).reshape(bs, S, D)
    h = jnp.maximum(sa @ params["w1"] + params["b1"], 0.0)
    ff = h @ params["w2"] + params["b2"]
    y = ff + x
    mu = y.mean(-1, keepdims=True)
    var = ((y - mu) ** 2).mean(-1, keepdims=True)
    return (y - mu) / jnp.sqrt(var + 1e-5) * params["gamma"] + params["beta"]


if __name__ == "__main__":
    attn_dim, len_dim, head, rank = 32, 64, 4, 8
    bs = 2

    key = jax.random.PRNGKey(0)
    kx, kp_key = jax.random.split(key)
    x = jax.random.normal(kx, (bs, len_dim, attn_dim), jnp.float32)
    params = init_params(kp_key, attn_dim, len_dim, head, rank)

    ref = reference_forward(params, x, head, rank)

    # f32 compute path (tight correctness check)
    kp32 = prepare_kernel_params(params, head, rank, compute_dtype=jnp.float32)
    fwd32 = jax.jit(functools.partial(block_self_forward, head=head, rank=rank,
                                      compute_dtype=jnp.float32))
    out32 = jax.block_until_ready(fwd32(kp32, x))
    assert out32.shape == (bs, len_dim, attn_dim)
    assert jnp.allclose(out32, ref, atol=2e-3, rtol=2e-3), float(jnp.max(jnp.abs(out32 - ref)))

    # bf16 MXU path (v6e/v7x-oriented): f32 accumulation, f32 softmax/LayerNorm.
    kpbf = prepare_kernel_params(params, head, rank, compute_dtype=jnp.bfloat16)
    fwdbf = jax.jit(functools.partial(block_self_forward, head=head, rank=rank,
                                      compute_dtype=jnp.bfloat16))
    outbf = jax.block_until_ready(fwdbf(kpbf, x))
    assert bool(jnp.all(jnp.isfinite(outbf)))
    assert float(jnp.max(jnp.abs(outbf - ref))) < 0.1

    print("KERNEL_OK")
</pallas_src>

<mosaic_0001>
module attributes {stable_mosaic.version = 11 : i64} {
  func.func @_qkv_kernel(%arg0: i32, %arg1: memref<128x32xf32, #tpu.memory_space<vmem>>, %arg2: memref<32x96xf32, #tpu.memory_space<vmem>>, %arg3: memref<1x96xf32, #tpu.memory_space<vmem>>, %arg4: memref<128x96xf32, #tpu.memory_space<vmem>>) attributes {dimension_semantics = [#tpu.dimension_semantics<parallel>], iteration_bounds = array<i64: 1>, scalar_prefetch = 0 : i64, scratch_operands = 0 : i64, tpu.core_type = #tpu.core_type<tc>, window_params = [{transform_indices = @transform_0, window_bounds = array<i64: 128, 32>}, {pipeline_mode = #tpu.pipeline_mode<synchronous>, transform_indices = @transform_1, window_bounds = array<i64: 32, 96>}, {pipeline_mode = #tpu.pipeline_mode<synchronous>, transform_indices = @transform_2, window_bounds = array<i64: 1, 96>}, {transform_indices = @transform_3, window_bounds = array<i64: 128, 96>}]} {
    %c0 = arith.constant 0 : index
    %c0_0 = arith.constant 0 : index
    %0 = vector.load %arg1[%c0, %c0_0] : memref<128x32xf32, #tpu.memory_space<vmem>>, vector<128x32xf32>
    %c0_1 = arith.constant 0 : index
    %c0_2 = arith.constant 0 : index
    %1 = vector.load %arg2[%c0_1, %c0_2] : memref<32x96xf32, #tpu.memory_space<vmem>>, vector<32x96xf32>
    %cst = arith.constant dense<0.000000e+00> : vector<128x96xf32>
    %2 = tpu.matmul %0, %1, %cst {dimension_numbers = #tpu.dot_dimension_numbers<[1], [0], [0], [1], [0, 0, 1, 1], [], []>} : vector<128x32xf32>, vector<32x96xf32>, vector<128x96xf32> -> vector<128x96xf32>
    %c0_3 = arith.constant 0 : index
    %c0_4 = arith.constant 0 : index
    %3 = vector.load %arg3[%c0_3, %c0_4] : memref<1x96xf32, #tpu.memory_space<vmem>>, vector<1x96xf32>
    %4 = vector.broadcast %3 : vector<1x96xf32> to vector<128x96xf32>
    %5 = arith.addf %2, %4 : vector<128x96xf32>
    %c0_5 = arith.constant 0 : index
    %c0_6 = arith.constant 0 : index
    %6 = vector.load %arg4[%c0_5, %c0_6] : memref<128x96xf32, #tpu.memory_space<vmem>>, vector<128x96xf32>
    tpu.vector_store %arg4[%c0_5, %c0_6], %5 {strides = array<i32>} : memref<128x96xf32, #tpu.memory_space<vmem>>, vector<128x96xf32>,
    return
  }
  func.func @transform_0(%arg0: i32) -> (i32, i32) {
    %c0_i32 = arith.constant 0 : i32
    %c0_i32_0 = arith.constant 0 : i32
    return %arg0, %c0_i32 : i32, i32
  }
  func.func @transform_1(%arg0: i32) -> (i32, i32) {
    %c0_i32 = arith.constant 0 : i32
    %c0_i32_0 = arith.constant 0 : i32
    %c0_i32_1 = arith.constant 0 : i32
    return %c0_i32, %c0_i32_0 : i32, i32
  }
  func.func @transform_2(%arg0: i32) -> (i32, i32) {
    %c0_i32 = arith.constant 0 : i32
    %c0_i32_0 = arith.constant 0 : i32
    %c0_i32_1 = arith.constant 0 : i32
    return %c0_i32, %c0_i32_0 : i32, i32
  }
  func.func @transform_3(%arg0: i32) -> (i32, i32) {
    %c0_i32 = arith.constant 0 : i32
    %c0_i32_0 = arith.constant 0 : i32
    return %arg0, %c0_i32 : i32, i32
  }
}

module attributes {stable_mosaic.version = 11 : i64} {
  func.func @_attn_kernel(%arg0: i32, %arg1: memref<1x8x8x32xf32, #tpu.memory_space<vmem>>, %arg2: memref<1x8x32x8xf32, #tpu.memory_space<vmem>>, %arg3: memref<1x8x32x8xf32, #tpu.memory_space<vmem>>, %arg4: memref<8x8x8xf32, #tpu.memory_space<vmem>>, %arg5: memref<1x8x8x32xf32, #tpu.memory_space<vmem>>) attributes {dimension_semantics = [#tpu.dimension_semantics<parallel>], iteration_bounds = array<i64: 2>, scalar_prefetch = 0 : i64, scratch_operands = 0 : i64, tpu.core_type = #tpu.core_type<tc>, window_params = [{transform_indices = @transform_0, window_bounds = array<i64: 1, 8, 8, 32>}, {transform_indices = @transform_1, window_bounds = array<i64: 1, 8, 32, 8>}, {transform_indices = @transform_2, window_bounds = array<i64: 1, 8, 32, 8>}, {pipeline_mode = #tpu.pipeline_mode<synchronous>, transform_indices = @transform_3, window_bounds = array<i64: 8, 8, 8>}, {transform_indices = @transform_4, window_bounds = array<i64: 1, 8, 8, 32>}]} {
    %c0 = arith.constant 0 : index
    %c0_0 = arith.constant 0 : index
    %c0_1 = arith.constant 0 : index
    %c0_2 = arith.constant 0 : index
    %0 = vector.load %arg1[%c0, %c0_0, %c0_1, %c0_2] : memref<1x8x8x32xf32, #tpu.memory_space<vmem>>, vector<1x8x8x32xf32>
    %1 = vector.shape_cast %0 : vector<1x8x8x32xf32> to vector<8x8x32xf32>
    %c0_3 = arith.constant 0 : index
    %c0_4 = arith.constant 0 : index
    %c0_5 = arith.constant 0 : index
    %c0_6 = arith.constant 0 : index
    %2 = vector.load %arg2[%c0_3, %c0_4, %c0_5, %c0_6] : memref<1x8x32x8xf32, #tpu.memory_space<vmem>>, vector<1x8x32x8xf32>
    %3 = vector.shape_cast %2 : vector<1x8x32x8xf32> to vector<8x32x8xf32>
    %c0_7 = arith.constant 0 : index
    %c0_8 = arith.constant 0 : index
    %c0_9 = arith.constant 0 : index
    %c0_10 = arith.constant 0 : index
    %4 = vector.load %arg3[%c0_7, %c0_8, %c0_9, %c0_10] : memref<1x8x32x8xf32, #tpu.memory_space<vmem>>, vector<1x8x32x8xf32>
    %5 = vector.shape_cast %4 : vector<1x8x32x8xf32> to vector<8x32x8xf32>
    %c0_11 = arith.constant 0 : index
    %c0_12 = arith.constant 0 : index
    %c0_13 = arith.constant 0 : index
    %6 = vector.load %arg4[%c0_11, %c0_12, %c0_13] : memref<8x8x8xf32, #tpu.memory_space<vmem>>, vector<8x8x8xf32>
    "tpu.trace_start"() <{level = 10 : i32, message = "aml,alr->amr"}> : () -> ()
    %cst = arith.constant dense<0.000000e+00> : vector<8x32x8xf32>
    %7 = tpu.matmul %3, %6, %cst {dimension_numbers = #tpu.dot_dimension_numbers<[2], [1], [1], [2], [0, 0, 0, 1, 1, 2], [0], [0]>} : vector<8x32x8xf32>, vector<8x8x8xf32>, vector<8x32x8xf32> -> vector<8x32x8xf32>
    %cst_14 = arith.constant dense<0.000000e+00> : vector<8x32x8xf32>
    %8 = tpu.matmul %5, %6, %cst_14 {dimension_numbers = #tpu.dot_dimension_numbers<[2], [1], [1], [2], [0, 0, 0, 1, 1, 2], [0], [0]>} : vector<8x32x8xf32>, vector<8x8x8xf32>, vector<8x32x8xf32> -> vector<8x32x8xf32>
    "tpu.trace_stop"() : () -> ()
    "tpu.trace_start"() <{level = 10 : i32, message = "alm,amr->alr"}> : () -> ()
    %cst_15 = arith.constant dense<0.000000e+00> : vector<8x8x8xf32>
    %9 = tpu.matmul %1, %7, %cst_15 {dimension_numbers = #tpu.dot_dimension_numbers<[2], [1], [1], [2], [0, 0, 0, 1, 1, 2], [0], [0]>} : vector<8x8x32xf32>, vector<8x32x8xf32>, vector<8x8x8xf32> -> vector<8x8x8xf32>
    "tpu.trace_stop"() : () -> ()
    %cst_16 = arith.constant dense<0xFF800000> : vector<8x8xf32>
    %10 = vector.multi_reduction <maximumf>, %9, %cst_16 [2] : vector<8x8x8xf32> to vector<8x8xf32>
    %11 = vector.shape_cast %10 : vector<8x8xf32> to vector<8x8x1xf32>
    %12 = vector.broadcast %11 : vector<8x8x1xf32> to vector<8x8x8xf32>
    %13 = arith.subf %9, %12 : vector<8x8x8xf32>
    %14 = math.exp %13 : vector<8x8x8xf32>
    %cst_17 = arith.constant dense<0.000000e+00> : vector<8x8xf32>
    %15 = vector.multi_reduction <add>, %14, %cst_17 [2] : vector<8x8x8xf32> to vector<8x8xf32>
    %16 = vector.shape_cast %15 : vector<8x8xf32> to vector<8x8x1xf32>
    %17 = tpu.reciprocal %16 : vector<8x8x1xf32> -> vector<8x8x1xf32>
    %18 = vector.broadcast %17 : vector<8x8x1xf32> to vector<8x8x8xf32>
    %19 = arith.mulf %14, %18 : vector<8x8x8xf32>
    "tpu.trace_start"() <{level = 10 : i32, message = "alr,amr->alm"}> : () -> ()
    %cst_18 = arith.constant dense<0.000000e+00> : vector<8x8x32xf32>
    %20 = tpu.matmul %19, %8, %cst_18 {dimension_numbers = #tpu.dot_dimension_numbers<[2], [2], [1], [1], [0, 0, 0, 1, 1, 1], [0], [0]>} : vector<8x8x8xf32>, vector<8x32x8xf32>, vector<8x8x32xf32> -> vector<8x8x32xf32>
    "tpu.trace_stop"() : () -> ()
    %c0_19 = arith.constant 0 : index
    %c0_20 = arith.constant 0 : index
    %c0_21 = arith.constant 0 : index
    %c0_22 = arith.constant 0 : index
    %21 = vector.load %arg5[%c0_19, %c0_20, %c0_21, %c0_22] : memref<1x8x8x32xf32, #tpu.memory_space<vmem>>, vector<1x8x8x32xf32>
    %22 = vector.shape_cast %21 : vector<1x8x8x32xf32> to vector<8x8x32xf32>
    %23 = vector.shape_cast %20 : vector<8x8x32xf32> to vector<1x8x8x32xf32>
    tpu.vector_store %arg5[%c0_19, %c0_20, %c0_21, %c0_22], %23 {strides = array<i32>} : memref<1x8x8x32xf32, #tpu.memory_space<vmem>>, vector<1x8x8x32xf32>,
    return
  }
  func.func @transform_0(%arg0: i32) -> (i32, i32, i32, i32) {
    %c0_i32 = arith.constant 0 : i32
    %c0_i32_0 = arith.constant 0 : i32
    %c0_i32_1 = arith.constant 0 : i32
    %c0_i32_2 = arith.constant 0 : i32
    return %arg0, %c0_i32, %c0_i32_0, %c0_i32_1 : i32, i32, i32, i32
  }
  func.func @transform_1(%arg0: i32) -> (i32, i32, i32, i32) {
    %c0_i32 = arith.constant 0 : i32
    %c0_i32_0 = arith.constant 0 : i32
    %c0_i32_1 = arith.constant 0 : i32
    %c0_i32_2 = arith.constant 0 : i32
    return %arg0, %c0_i32, %c0_i32_0, %c0_i32_1 : i32, i32, i32, i32
  }
  func.func @transform_2(%arg0: i32) -> (i32, i32, i32, i32) {
    %c0_i32 = arith.constant 0 : i32
    %c0_i32_0 = arith.constant 0 : i32
    %c0_i32_1 = arith.constant 0 : i32
    %c0_i32_2 = arith.constant 0 : i32
    return %arg0, %c0_i32, %c0_i32_0, %c0_i32_1 : i32, i32, i32, i32
  }
  func.func @transform_3(%arg0: i32) -> (i32, i32, i32) {
    %c0_i32 = arith.constant 0 : i32
    %c0_i32_0 = arith.constant 0 : i32
    %c0_i32_1 = arith.constant 0 : i32
    %c0_i32_2 = arith.constant 0 : i32
    return %c0_i32, %c0_i32_0, %c0_i32_1 : i32, i32, i32
  }
  func.func @transform_4(%arg0: i32) -> (i32, i32, i32, i32) {
    %c0_i32 = arith.constant 0 : i32
    %c0_i32_0 = arith.constant 0 : i32
    %c0_i32_1 = arith.constant 0 : i32
    %c0_i32_2 = arith.constant 0 : i32
    return %arg0, %c0_i32, %c0_i32_0, %c0_i32_1 : i32, i32, i32, i32
  }
}

module attributes {stable_mosaic.version = 11 : i64} {
  func.func @_ffn_ln_kernel(%arg0: i32, %arg1: memref<128x32xf32, #tpu.memory_space<vmem>>, %arg2: memref<128x32xf32, #tpu.memory_space<vmem>>, %arg3: memref<32x64xf32, #tpu.memory_space<vmem>>, %arg4: memref<1x64xf32, #tpu.memory_space<vmem>>, %arg5: memref<64x32xf32, #tpu.memory_space<vmem>>, %arg6: memref<1x32xf32, #tpu.memory_space<vmem>>, %arg7: memref<1x32xf32, #tpu.memory_space<vmem>>, %arg8: memref<1x32xf32, #tpu.memory_space<vmem>>, %arg9: memref<128x32xf32, #tpu.memory_space<vmem>>) attributes {dimension_semantics = [#tpu.dimension_semantics<parallel>], iteration_bounds = array<i64: 1>, scalar_prefetch = 0 : i64, scratch_operands = 0 : i64, tpu.core_type = #tpu.core_type<tc>, window_params = [{transform_indices = @transform_0, window_bounds = array<i64: 128, 32>}, {transform_indices = @transform_1, window_bounds = array<i64: 128, 32>}, {pipeline_mode = #tpu.pipeline_mode<synchronous>, transform_indices = @transform_2, window_bounds = array<i64: 32, 64>}, {pipeline_mode = #tpu.pipeline_mode<synchronous>, transform_indices = @transform_3, window_bounds = array<i64: 1, 64>}, {pipeline_mode = #tpu.pipeline_mode<synchronous>, transform_indices = @transform_4, window_bounds = array<i64: 64, 32>}, {pipeline_mode = #tpu.pipeline_mode<synchronous>, transform_indices = @transform_5, window_bounds = array<i64: 1, 32>}, {pipeline_mode = #tpu.pipeline_mode<synchronous>, transform_indices = @transform_6, window_bounds = array<i64: 1, 32>}, {pipeline_mode = #tpu.pipeline_mode<synchronous>, transform_indices = @transform_7, window_bounds = array<i64: 1, 32>}, {transform_indices = @transform_8, window_bounds = array<i64: 128, 32>}]} {
    %c0 = arith.constant 0 : index
    %c0_0 = arith.constant 0 : index
    %0 = vector.load %arg1[%c0, %c0_0] : memref<128x32xf32, #tpu.memory_space<vmem>>, vector<128x32xf32>
    %c0_1 = arith.constant 0 : index
    %c0_2 = arith.constant 0 : index
    %1 = vector.load %arg3[%c0_1, %c0_2] : memref<32x64xf32, #tpu.memory_space<vmem>>, vector<32x64xf32>
    %cst = arith.constant dense<0.000000e+00> : vector<128x64xf32>
    %2 = tpu.matmul %0, %1, %cst {dimension_numbers = #tpu.dot_dimension_numbers<[1], [0], [0], [1], [0, 0, 1, 1], [], []>} : vector<128x32xf32>, vector<32x64xf32>, vector<128x64xf32> -> vector<128x64xf32>
    %c0_3 = arith.constant 0 : index
    %c0_4 = arith.constant 0 : index
    %3 = vector.load %arg4[%c0_3, %c0_4] : memref<1x64xf32, #tpu.memory_space<vmem>>, vector<1x64xf32>
    %4 = vector.broadcast %3 : vector<1x64xf32> to vector<128x64xf32>
    %5 = arith.addf %2, %4 : vector<128x64xf32>
    %cst_5 = arith.constant 0.000000e+00 : f32
    %6 = vector.broadcast %cst_5 : f32 to vector<128x64xf32>
    %7 = arith.maximumf %5, %6 : vector<128x64xf32>
    %c0_6 = arith.constant 0 : index
    %c0_7 = arith.constant 0 : index
    %8 = vector.load %arg5[%c0_6, %c0_7] : memref<64x32xf32, #tpu.memory_space<vmem>>, vector<64x32xf32>
    %cst_8 = arith.constant dense<0.000000e+00> : vector<128x32xf32>
    %9 = tpu.matmul %7, %8, %cst_8 {dimension_numbers = #tpu.dot_dimension_numbers<[1], [0], [0], [1], [0, 0, 1, 1], [], []>} : vector<128x64xf32>, vector<64x32xf32>, vector<128x32xf32> -> vector<128x32xf32>
    %c0_9 = arith.constant 0 : index
    %c0_10 = arith.constant 0 : index
    %10 = vector.load %arg6[%c0_9, %c0_10] : memref<1x32xf32, #tpu.memory_space<vmem>>, vector<1x32xf32>
    %11 = vector.broadcast %10 : vector<1x32xf32> to vector<128x32xf32>
    %12 = arith.addf %9, %11 : vector<128x32xf32>
    %c0_11 = arith.constant 0 : index
    %c0_12 = arith.constant 0 : index
    %13 = vector.load %arg2[%c0_11, %c0_12] : memref<128x32xf32, #tpu.memory_space<vmem>>, vector<128x32xf32>
    %14 = arith.addf %12, %13 : vector<128x32xf32>
    %cst_13 = arith.constant dense<0.000000e+00> : vector<128xf32>
    %15 = vector.multi_reduction <add>, %14, %cst_13 [1] : vector<128x32xf32> to vector<128xf32>
    %16 = vector.shape_cast %15 : vector<128xf32> to vector<128x1xf32>
    %cst_14 = arith.constant 3.200000e+01 : f32
    %17 = vector.broadcast %cst_14 : f32 to vector<128x1xf32>
    %18 = arith.divf %16, %17 : vector<128x1xf32>
    %19 = vector.broadcast %18 : vector<128x1xf32> to vector<128x32xf32>
    %20 = arith.subf %14, %19 : vector<128x32xf32>
    %21 = arith.mulf %20, %20 : vector<128x32xf32>
    %cst_15 = arith.constant dense<0.000000e+00> : vector<128xf32>
    %22 = vector.multi_reduction <add>, %21, %cst_15 [1] : vector<128x32xf32> to vector<128xf32>
    %23 = vector.shape_cast %22 : vector<128xf32> to vector<128x1xf32>
    %cst_16 = arith.constant 3.200000e+01 : f32
    %24 = vector.broadcast %cst_16 : f32 to vector<128x1xf32>
    %25 = arith.divf %23, %24 : vector<128x1xf32>
    %cst_17 = arith.constant 9.99999974E-6 : f32
    %26 = vector.broadcast %cst_17 : f32 to vector<128x1xf32>
    %27 = arith.addf %25, %26 : vector<128x1xf32>
    %28 = math.rsqrt %27 : vector<128x1xf32>
    %29 = vector.broadcast %28 : vector<128x1xf32> to vector<128x32xf32>
    %30 = arith.mulf %20, %29 : vector<128x32xf32>
    %c0_18 = arith.constant 0 : index
    %c0_19 = arith.constant 0 : index
    %31 = vector.load %arg7[%c0_18, %c0_19] : memref<1x32xf32, #tpu.memory_space<vmem>>, vector<1x32xf32>
    %32 = vector.broadcast %31 : vector<1x32xf32> to vector<128x32xf32>
    %33 = arith.mulf %30, %32 : vector<128x32xf32>
    %c0_20 = arith.constant 0 : index
    %c0_21 = arith.constant 0 : index
    %34 = vector.load %arg8[%c0_20, %c0_21] : memref<1x32xf32, #tpu.memory_space<vmem>>, vector<1x32xf32>
    %35 = vector.broadcast %34 : vector<1x32xf32> to vector<128x32xf32>
    %36 = arith.addf %33, %35 : vector<128x32xf32>
    %c0_22 = arith.constant 0 : index
    %c0_23 = arith.constant 0 : index
    %37 = vector.load %arg9[%c0_22, %c0_23] : memref<128x32xf32, #tpu.memory_space<vmem>>, vector<128x32xf32>
    tpu.vector_store %arg9[%c0_22, %c0_23], %36 {strides = array<i32>} : memref<128x32xf32, #tpu.memory_space<vmem>>, vector<128x32xf32>,
    return
  }
  func.func @transform_0(%arg0: i32) -> (i32, i32) {
    %c0_i32 = arith.constant 0 : i32
    %c0_i32_0 = arith.constant 0 : i32
    return %arg0, %c0_i32 : i32, i32
  }
  func.func @transform_1(%arg0: i32) -> (i32, i32) {
    %c0_i32 = arith.constant 0 : i32
    %c0_i32_0 = arith.constant 0 : i32
    return %arg0, %c0_i32 : i32, i32
  }
  func.func @transform_2(%arg0: i32) -> (i32, i32) {
    %c0_i32 = arith.constant 0 : i32
    %c0_i32_0 = arith.constant 0 : i32
    %c0_i32_1 = arith.constant 0 : i32
    return %c0_i32, %c0_i32_0 : i32, i32
  }
  func.func @transform_3(%arg0: i32) -> (i32, i32) {
    %c0_i32 = arith.constant 0 : i32
    %c0_i32_0 = arith.constant 0 : i32
    %c0_i32_1 = arith.constant 0 : i32
    return %c0_i32, %c0_i32_0 : i32, i32
  }
  func.func @transform_4(%arg0: i32) -> (i32, i32) {
    %c0_i32 = arith.constant 0 : i32
    %c0_i32_0 = arith.constant 0 : i32
    %c0_i32_1 = arith.constant 0 : i32
    return %c0_i32, %c0_i32_0 : i32, i32
  }
  func.func @transform_5(%arg0: i32) -> (i32, i32) {
    %c0_i32 = arith.constant 0 : i32
    %c0_i32_0 = arith.constant 0 : i32
    %c0_i32_1 = arith.constant 0 : i32
    return %c0_i32, %c0_i32_0 : i32, i32
  }
  func.func @transform_6(%arg0: i32) -> (i32, i32) {
    %c0_i32 = arith.constant 0 : i32
    %c0_i32_0 = arith.constant 0 : i32
    %c0_i32_1 = arith.constant 0 : i32
    return %c0_i32, %c0_i32_0 : i32, i32
  }
  func.func @transform_7(%arg0: i32) -> (i32, i32) {
    %c0_i32 = arith.constant 0 : i32
    %c0_i32_0 = arith.constant 0 : i32
    %c0_i32_1 = arith.constant 0 : i32
    return %c0_i32, %c0_i32_0 : i32, i32
  }
  func.func @transform_8(%arg0: i32) -> (i32, i32) {
    %c0_i32 = arith.constant 0 : i32
    %c0_i32_0 = arith.constant 0 : i32
    return %arg0, %c0_i32 : i32, i32
  }
}

</mosaic_0001>

<bundles_post_ra>
// kernel: block_self_forward.3
= control target key start
LH: loop header
LB: loop body
LE: loop exit
PB: predicated region body
PF: predicated region fallthrough
CT: control target
= control target key end

     0   :  { %vm38_vm0 = vcmask 261120   ;;  %vm152_vm1 = vcmask 785408   ;;  %s365_s1 = inlined_call_operand.vmem [shape: f32[32,96], index: 1, kind: input, shape index: {}]   ;;  %s366_s0 = inlined_call_operand.vmem [shape: f32[128,32], index: 0, kind: input, shape index: {}]   ;;  %s367_s2 = inlined_call_operand.vmem [shape: f32[1,96], index: 2, kind: input, shape index: {}]   ;;  %s368_s3 = inlined_call_operand.vmem [shape: f32[128,96], index: 3, kind: output, shape index: {}]  }
   0x1   :  { %v33_v0 = vld [vmem:[%s365_s1 + $0x18] sm:$0xff]  ;;  %v32_v1 = vld [vmem:[%s365_s1 + $0x10] sm:$0xff]  ;;  %v31_v2 = vld [vmem:[%s365_s1 + $0x8] sm:$0xff] }
   0x2   :  { %190 = vmatpush.msra.mxu2 %v33_v0  ;;  %191 = vmatpush.msra.mxu3 %v33_v0  ;;  %v30_v3 = vld [vmem:[%s365_s1] sm:$0xff]  ;;  %v23_v8 = vld [vmem:[%s366_s0 + $0x48] sm:$0xff]  ;;  %v24_v12 = vld [vmem:[%s366_s0 + $0x50] sm:$0xff] }
   0x3   :  { %99 = vmatpush.msra.mxu0 %v33_v0  ;;  %189 = vmatpush.msra.mxu1 %v33_v0  ;;  %v22_v4 = vld [vmem:[%s366_s0 + $0x40] sm:$0xff]  ;;  %v27_v9 = vld [vmem:[%s366_s0 + $0x68] sm:$0xff]  ;;  %v28_v13 = vld [vmem:[%s366_s0 + $0x70] sm:$0xff] }
   0x4   :  { %193 = vmatpush.msra.mxu2 %v32_v1  ;;  %194 = vmatpush.msra.mxu3 %v32_v1  ;;  %v26_v5 = vld [vmem:[%s366_s0 + $0x60] sm:$0xff]  ;;  %v15_v10 = vld [vmem:[%s366_s0 + $0x8] sm:$0xff]  ;;  %v16_v14 = vld [vmem:[%s366_s0 + $0x10] sm:$0xff] }
   0x5   :  { %100 = vmatpush.msra.mxu0 %v32_v1  ;;  %192 = vmatpush.msra.mxu1 %v32_v1  ;;  %v14_v6 = vld [vmem:[%s366_s0] sm:$0xff]  ;;  %v19_v11 = vld [vmem:[%s366_s0 + $0x28] sm:$0xff]  ;;  %v20_v15 = vld [vmem:[%s366_s0 + $0x30] sm:$0xff] }
   0x6   :  { %196 = vmatpush.msra.mxu2 %v31_v2  ;;  %197 = vmatpush.msra.mxu3 %v31_v2  ;;  %v18_v7 = vld [vmem:[%s366_s0 + $0x20] sm:$0xff]  ;;  %v25_v16 = vld [vmem:[%s366_s0 + $0x58] sm:$0xff] }
   0x7   :  { %101 = vmatpush.msra.mxu0 %v31_v2  ;;  %195 = vmatpush.msra.mxu1 %v31_v2  ;;  %v29_v17 = vld [vmem:[%s366_s0 + $0x78] sm:$0xff]  ;;  %v201_v20 = vld [vmem:[%s367_s2] ss:$0 sm:$0xff] }
   0x8   :  { %199 = vmatpush.msra.mxu2 %v30_v3  ;;  %200 = vmatpush.msra.mxu3 %v30_v3  ;;  %v17_v18 = vld [vmem:[%s366_s0 + $0x18] sm:$0xff] }
   0x9   :  { %181 = vmatmul.msk.f32.vlgmr.msra.gmra.mxu2 %vm38_vm0, %v22_v4  ;;  %185 = vmatmul.msk.f32.vlgmr.msra.gmra.mxu3 %vm38_vm0, %v26_v5  ;;  %v21_v19 = vld [vmem:[%s366_s0 + $0x38] sm:$0xff] }
   0xa   :  { %102 = vmatpush.msra.mxu0 %v30_v3  ;;  %198 = vmatpush.msra.mxu1 %v30_v3 }
   0xb   :  { %173 = vmatmul.msk.f32.vlgmr.msra.gmra.mxu0 %vm38_vm0, %v14_v6  ;;  %177 = vmatmul.msk.f32.vlgmr.msra.gmra.mxu1 %vm38_vm0, %v18_v7 }
  0x11   :  { %182 = vmatmul.msk.f32.gmra.mxu2 %vm38_vm0, %v23_v8  ;;  %186 = vmatmul.msk.f32.gmra.mxu3 %vm38_vm0, %v27_v9 }
  0x13   :  { %174 = vmatmul.msk.f32.gmra.mxu0 %vm38_vm0, %v15_v10  ;;  %178 = vmatmul.msk.f32.gmra.mxu1 %vm38_vm0, %v19_v11 }
  0x19   :  { %183 = vmatmul.msk.f32.gmra.mxu2 %vm38_vm0, %v24_v12  ;;  %187 = vmatmul.msk.f32.gmra.mxu3 %vm38_vm0, %v28_v13 }
  0x1b   :  { %175 = vmatmul.msk.f32.gmra.mxu0 %vm38_vm0, %v16_v14  ;;  %179 = vmatmul.msk.f32.gmra.mxu1 %vm38_vm0, %v20_v15 }
  0x21   :  { %184 = vmatmul.msk.f32.gmra.mxu2 %vm38_vm0, %v25_v16  ;;  %188 = vmatmul.msk.f32.gmra.mxu3 %vm38_vm0, %v29_v17 }
  0x23   :  { %176 = vmatmul.msk.f32.gmra.mxu0 %vm38_vm0, %v17_v18  ;;  %180 = vmatmul.msk.f32.gmra.mxu1 %vm38_vm0, %v21_v19 }
  0x88   :  { %v104_v21 = vpop.f32.mrf.mxu0  ;;  %v116_v22 = vpop.f32.mrf.mxu1 }
  0x89   :  { %v105_v23 = vadd.f32 %v201_v20, %v104_v21  ;;  %v117_v24 = vadd.f32 %v201_v20, %v116_v22 }
  0x8b   :  { %153 = vst.msk [vmem:[%s368_s3] sm:$0xff] %vm152_vm1, %v105_v23 }
  0x8c   :  { %157 = vst.msk [vmem:[%s368_s3 + $0x20] sm:$0xff] %vm152_vm1, %v117_v24  ;;  %v128_v25 = vpop.f32.mrf.mxu2  ;;  %v140_v26 = vpop.f32.mrf.mxu3 }
  0x8d   :  { %v129_v27 = vadd.f32 %v201_v20, %v128_v25  ;;  %v141_v28 = vadd.f32 %v201_v20, %v140_v26 }
  0x8f   :  { %161 = vst.msk [vmem:[%s368_s3 + $0x40] sm:$0xff] %vm152_vm1, %v129_v27 }
  0x90   :  { %165 = vst.msk [vmem:[%s368_s3 + $0x60] sm:$0xff] %vm152_vm1, %v141_v28  ;;  %v107_v29 = vpop.f32.mrf.mxu0  ;;  %v119_v30 = vpop.f32.mrf.mxu1 }
  0x91   :  { %v108_v31 = vadd.f32 %v201_v20, %v107_v29  ;;  %v120_v32 = vadd.f32 %v201_v20, %v119_v30 }
  0x93   :  { %154 = vst.msk [vmem:[%s368_s3 + $0x8] sm:$0xff] %vm152_vm1, %v108_v31 }
  0x94   :  { %158 = vst.msk [vmem:[%s368_s3 + $0x28] sm:$0xff] %vm152_vm1, %v120_v32  ;;  %v131_v33 = vpop.f32.mrf.mxu2  ;;  %v143_v34 = vpop.f32.mrf.mxu3 }
  0x95   :  { %v132_v35 = vadd.f32 %v201_v20, %v131_v33  ;;  %v144_v36 = vadd.f32 %v201_v20, %v143_v34 }
  0x97   :  { %162 = vst.msk [vmem:[%s368_s3 + $0x48] sm:$0xff] %vm152_vm1, %v132_v35 }
  0x98   :  { %166 = vst.msk [vmem:[%s368_s3 + $0x68] sm:$0xff] %vm152_vm1, %v144_v36  ;;  %v110_v37 = vpop.f32.mrf.mxu0  ;;  %v122_v38 = vpop.f32.mrf.mxu1 }
  0x99   :  { %v111_v39 = vadd.f32 %v201_v20, %v110_v37  ;;  %v123_v40 = vadd.f32 %v201_v20, %v122_v38 }
  0x9b   :  { %155 = vst.msk [vmem:[%s368_s3 + $0x10] sm:$0xff] %vm152_vm1, %v111_v39 }
  0x9c   :  { %159 = vst.msk [vmem:[%s368_s3 + $0x30] sm:$0xff] %vm152_vm1, %v123_v40  ;;  %v134_v41 = vpop.f32.mrf.mxu2  ;;  %v146_v42 = vpop.f32.mrf.mxu3 }
  0x9d   :  { %v135_v43 = vadd.f32 %v201_v20, %v134_v41  ;;  %v147_v44 = vadd.f32 %v201_v20, %v146_v42 }
  0x9f   :  { %163 = vst.msk [vmem:[%s368_s3 + $0x50] sm:$0xff] %vm152_vm1, %v135_v43 }
  0xa0   :  { %167 = vst.msk [vmem:[%s368_s3 + $0x70] sm:$0xff] %vm152_vm1, %v147_v44  ;;  %v113_v45 = vpop.f32.mrf.mxu0  ;;  %v125_v46 = vpop.f32.mrf.mxu1 }
  0xa1   :  { %v114_v47 = vadd.f32 %v201_v20, %v113_v45  ;;  %v126_v48 = vadd.f32 %v201_v20, %v125_v46 }
  0xa3   :  { %156 = vst.msk [vmem:[%s368_s3 + $0x18] sm:$0xff] %vm152_vm1, %v114_v47 }
  0xa4   :  { %160 = vst.msk [vmem:[%s368_s3 + $0x38] sm:$0xff] %vm152_vm1, %v126_v48  ;;  %v137_v49 = vpop.f32.mrf.mxu2  ;;  %v149_v50 = vpop.f32.mrf.mxu3 }
  0xa5   :  { %v138_v51 = vadd.f32 %v201_v20, %v137_v49  ;;  %v150_v52 = vadd.f32 %v201_v20, %v149_v50 }
  0xa7   :  { %164 = vst.msk [vmem:[%s368_s3 + $0x58] sm:$0xff] %vm152_vm1, %v138_v51 }
  0xa8   :  { %168 = vst.msk [vmem:[%s368_s3 + $0x78] sm:$0xff] %vm152_vm1, %v150_v52 }

// kernel: block_self_forward.5
= control target key start
LH: loop header
LB: loop body
LE: loop exit
PB: predicated region body
PF: predicated region fallthrough
CT: control target
= control target key end

     0   :  { %vm53_vm0 = vcmask 261120   ;;  %vm195_vm1 = vcmask 523264   ;;  %s1411_s2 = inlined_call_operand.vmem [shape: f32[32,64], index: 2, kind: input, shape index: {}]   ;;  %s1412_s0 = inlined_call_operand.vmem [shape: f32[128,32], index: 0, kind: input, shape index: {}]   ;;  %s1413_s3 = inlined_call_operand.vmem [shape: f32[1,64], index: 3, kind: input, shape index: {}]   ;;  %s1414_s4 = inlined_call_operand.vmem [shape: f32[64,32], index: 4, kind: input, shape index: {}]   ;;  %s1415_s5 = inlined_call_operand.vmem [shape: f32[1,32], index: 5, kind: input, shape index: {}]   ;;  %s1416_s1 = inlined_call_operand.vmem [shape: f32[128,32], index: 1, kind: input, shape index: {}]   ;;  %s1417_s6 = inlined_call_operand.vmem [shape: f32[1,32], index: 6, kind: input, shape index: {}]   ;;  %s1418_s7 = inlined_call_operand.vmem [shape: f32[1,32], index: 7, kind: input, shape index: {}]   ;;  %s1419_s8 = inlined_call_operand.vmem [shape: f32[128,32], index: 8, kind: output, shape index: {}]  }
   0x1   :  { %v48_v0 = vld [vmem:[%s1411_s2 + $0x18] sm:$0xff]  ;;  %v47_v1 = vld [vmem:[%s1411_s2 + $0x10] sm:$0xff]  ;;  %v46_v2 = vld [vmem:[%s1411_s2 + $0x8] sm:$0xff] }
   0x2   :  { %114 = vmatpush.msra.mxu0 %v48_v0  ;;  %792 = vmatpush.msra.mxu3 %v48_v0  ;;  %v45_v3 = vld [vmem:[%s1411_s2] sm:$0xff]  ;;  %v30_v5 = vld [vmem:[%s1412_s0 + $0x8] sm:$0xff]  ;;  %v31_v6 = vld [vmem:[%s1412_s0 + $0x10] sm:$0xff] }
   0x3   :  { %v29_v4 = vld [vmem:[%s1412_s0] sm:$0xff]  ;;  %v32_v7 = vld [vmem:[%s1412_s0 + $0x18] sm:$0xff]  ;;  %v38_v9 = vld [vmem:[%s1412_s0 + $0x48] sm:$0xff] }
   0x4   :  { %115 = vmatpush.msra.mxu0 %v47_v1  ;;  %793 = vmatpush.msra.mxu3 %v47_v1  ;;  %v33_v8 = vld [vmem:[%s1412_s0 + $0x20] sm:$0xff]  ;;  %v34_v10 = vld [vmem:[%s1412_s0 + $0x28] sm:$0xff]  ;;  %v39_v11 = vld [vmem:[%s1412_s0 + $0x50] sm:$0xff] }
   0x5   :  { %v35_v12 = vld [vmem:[%s1412_s0 + $0x30] sm:$0xff]  ;;  %v40_v13 = vld [vmem:[%s1412_s0 + $0x58] sm:$0xff]  ;;  %v188_v16 = vld [vmem:[%s1414_s4 + $0x28] sm:$0xff] }
   0x6   :  { %116 = vmatpush.msra.mxu0 %v46_v2  ;;  %794 = vmatpush.msra.mxu3 %v46_v2  ;;  %v190_v14 = vld [vmem:[%s1414_s4 + $0x38] sm:$0xff]  ;;  %v189_v15 = vld [vmem:[%s1414_s4 + $0x30] sm:$0xff]  ;;  %v187_v18 = vld [vmem:[%s1414_s4 + $0x20] sm:$0xff] }
   0x7   :  { %252 = vmatpush.msra.mxu1 %v190_v14  ;;  %796 = vmatpush.msra.mxu2 %v190_v14  ;;  %v36_v17 = vld [vmem:[%s1412_s0 + $0x38] sm:$0xff]  ;;  %v41_v19 = vld [vmem:[%s1412_s0 + $0x60] sm:$0xff]  ;;  %v42_v22 = vld [vmem:[%s1412_s0 + $0x68] sm:$0xff] }
   0x8   :  { %117 = vmatpush.msra.mxu0 %v45_v3  ;;  %795 = vmatpush.msra.mxu3 %v45_v3  ;;  %v186_v20 = vld [vmem:[%s1414_s4 + $0x18] sm:$0xff]  ;;  %v37_v21 = vld [vmem:[%s1412_s0 + $0x40] sm:$0xff]  ;;  %v43_v23 = vld [vmem:[%s1412_s0 + $0x70] sm:$0xff] }
   0x9   :  { %760 = vmatmul.msk.f32.vlgmr.msra.gmra.mxu0 %vm53_vm0, %v29_v4  ;;  %769 = vmatmul.msk.f32.vlgmr.msra.gmra.mxu3 %vm53_vm0, %v38_v9  ;;  %v44_v24 = vld [vmem:[%s1412_s0 + $0x78] sm:$0xff]  ;;  %v185_v25 = vld [vmem:[%s1414_s4 + $0x10] sm:$0xff]  ;;  %v184_v26 = vld [vmem:[%s1414_s4 + $0x8] sm:$0xff] }
   0xa   :  { %253 = vmatpush.msra.mxu1 %v189_v15  ;;  %797 = vmatpush.msra.mxu2 %v189_v15  ;;  %v183_v27 = vld [vmem:[%s1414_s4] sm:$0xff] }
   0xb   :  { %v992_v28 = vld [vmem:[%s1413_s3] ss:$0 sm:$0xff] }
   0xc   :  { %254 = vmatpush.msra.mxu1 %v188_v16  ;;  %798 = vmatpush.msra.mxu2 %v188_v16  ;;  %v309_v15 = vld [vmem:[%s1416_s1] sm:$0xff] }
   0xe   :  { %255 = vmatpush.msra.mxu1 %v187_v18  ;;  %799 = vmatpush.msra.mxu2 %v187_v18 }
  0x10   :  { %256 = vmatpush.msra.mxu1 %v186_v20  ;;  %800 = vmatpush.msra.mxu2 %v186_v20  ;;  %v310_v20 = vld [vmem:[%s1416_s1 + $0x8] sm:$0xff] }
  0x11   :  { %761 = vmatmul.msk.f32.gmra.mxu0 %vm53_vm0, %v30_v5  ;;  %770 = vmatmul.msk.f32.gmra.mxu3 %vm53_vm0, %v39_v11 }
  0x12   :  { %257 = vmatpush.msra.mxu1 %v185_v25  ;;  %801 = vmatpush.msra.mxu2 %v185_v25  ;;  %v311_v25 = vld [vmem:[%s1416_s1 + $0x10] sm:$0xff] }
  0x14   :  { %258 = vmatpush.msra.mxu1 %v184_v26  ;;  %802 = vmatpush.msra.mxu2 %v184_v26 }
  0x16   :  { %259 = vmatpush.msra.mxu1 %v183_v27  ;;  %803 = vmatpush.msra.mxu2 %v183_v27 }
  0x19   :  { %762 = vmatmul.msk.f32.gmra.mxu0 %vm53_vm0, %v31_v6  ;;  %771 = vmatmul.msk.f32.gmra.mxu3 %vm53_vm0, %v40_v13  ;;  %v1029_v13 = vld [vmem:[%s1415_s5] ss:$0 sm:$0xff] }
  0x21   :  { %763 = vmatmul.msk.f32.gmra.mxu0 %vm53_vm0, %v32_v7  ;;  %772 = vmatmul.msk.f32.gmra.mxu3 %vm53_vm0, %v41_v19 }
  0x29   :  { %764 = vmatmul.msk.f32.gmra.mxu0 %vm53_vm0, %v33_v8  ;;  %773 = vmatmul.msk.f32.gmra.mxu3 %vm53_vm0, %v42_v22 }
  0x31   :  { %765 = vmatmul.msk.f32.gmra.mxu0 %vm53_vm0, %v34_v10  ;;  %774 = vmatmul.msk.f32.gmra.mxu3 %vm53_vm0, %v43_v23 }
  0x39   :  { %766 = vmatmul.msk.f32.gmra.mxu0 %vm53_vm0, %v35_v12  ;;  %775 = vmatmul.msk.f32.gmra.mxu3 %vm53_vm0, %v44_v24 }
  0x41   :  { %767 = vmatmul.msk.f32.gmra.mxu0 %vm53_vm0, %v36_v17 }
  0x49   :  { %768 = vmatmul.msk.f32.gmra.mxu0 %vm53_vm0, %v37_v21 }
  0x86   :  { %v119_v29 = vpop.f32.mrf.mxu0 }
  0x87   :  { %v120_v30 = vadd.f32 %v992_v28, %v119_v29 }
  0x89   :  { %v167_v31 = vmax.f32 %v120_v30, 0.0  ;;  %v312_v30 = vld [vmem:[%s1416_s1 + $0x18] sm:$0xff] }
  0x8b   :  { %776 = vmatmul.msk.f32.vlgmr.msra.gmra.mxu1 %vm195_vm1, %v167_v31 }
  0x8c   :  { %v146_v50 = vpop.f32.mrf.mxu3 }
  0x8d   :  { %v147_v58 = vadd.f32 %v992_v28, %v146_v50  ;;  %v316_v50 = vld [vmem:[%s1416_s1 + $0x38] sm:$0xff] }
  0x8e   :  { %v122_v32 = vpop.f32.mrf.mxu0 }
  0x8f   :  { %v123_v33 = vadd.f32 %v992_v28, %v122_v32  ;;  %v176_v59 = vmax.f32 %v147_v58, 0.0 }
  0x91   :  { %v168_v34 = vmax.f32 %v123_v33, 0.0 }
  0x93   :  { %777 = vmatmul.msk.f32.gmra.mxu1 %vm195_vm1, %v168_v34 }
  0x94   :  { %v149_v55 = vpop.f32.mrf.mxu3 }
  0x95   :  { %v150_v61 = vadd.f32 %v992_v28, %v149_v55  ;;  %v317_v55 = vld [vmem:[%s1416_s1 + $0x40] sm:$0xff] }
  0x96   :  { %v125_v35 = vpop.f32.mrf.mxu0 }
  0x97   :  { %v126_v36 = vadd.f32 %v992_v28, %v125_v35  ;;  %v177_v62 = vmax.f32 %v150_v61, 0.0  ;;  %v313_v35 = vld [vmem:[%s1416_s1 + $0x20] sm:$0xff] }
  0x99   :  { %v169_v37 = vmax.f32 %v126_v36, 0.0 }
  0x9b   :  { %778 = vmatmul.msk.f32.gmra.mxu1 %vm195_vm1, %v169_v37 }
  0x9c   :  { %v152_v60 = vpop.f32.mrf.mxu3 }
  0x9d   :  { %v153_v0 = vadd.f32 %v992_v28, %v152_v60  ;;  %v318_v60 = vld [vmem:[%s1416_s1 + $0x48] sm:$0xff] }
  0x9e   :  { %v128_v38 = vpop.f32.mrf.mxu0 }
  0x9f   :  { %v129_v39 = vadd.f32 %v992_v28, %v128_v38  ;;  %v178_v1 = vmax.f32 %v153_v0, 0.0 }
  0xa1   :  { %v170_v40 = vmax.f32 %v129_v39, 0.0 }
  0xa3   :  { %779 = vmatmul.msk.f32.gmra.mxu1 %vm195_vm1, %v170_v40  ;;  %v314_v40 = vld [vmem:[%s1416_s1 + $0x28] sm:$0xff] }
  0xa4   :  { %v155_v63 = vpop.f32.mrf.mxu3 }
  0xa5   :  { %v156_v2 = vadd.f32 %v992_v28, %v155_v63 }
  0xa6   :  { %v131_v41 = vpop.f32.mrf.mxu0 }
  0xa7   :  { %v132_v42 = vadd.f32 %v992_v28, %v131_v41  ;;  %v179_v4 = vmax.f32 %v156_v2, 0.0 }
  0xa9   :  { %v171_v43 = vmax.f32 %v132_v42, 0.0 }
  0xab   :  { %780 = vmatmul.msk.f32.gmra.mxu1 %vm195_vm1, %v171_v43 }
  0xac   :  { %v158_v3 = vpop.f32.mrf.mxu3 }
  0xad   :  { %v159_v5 = vadd.f32 %v992_v28, %v158_v3 }
  0xae   :  { %v134_v44 = vpop.f32.mrf.mxu0 }
  0xaf   :  { %v135_v45 = vadd.f32 %v992_v28, %v134_v44  ;;  %v180_v7 = vmax.f32 %v159_v5, 0.0 }
  0xb1   :  { %v172_v46 = vmax.f32 %v135_v45, 0.0  ;;  %v315_v45 = vld [vmem:[%s1416_s1 + $0x30] sm:$0xff] }
  0xb3   :  { %781 = vmatmul.msk.f32.gmra.mxu1 %vm195_vm1, %v172_v46 }
  0xb4   :  { %v161_v6 = vpop.f32.mrf.mxu3 }
  0xb5   :  { %v162_v8 = vadd.f32 %v992_v28, %v161_v6  ;;  %v320_v6 = vld [vmem:[%s1416_s1 + $0x58] sm:$0xff] }
  0xb6   :  { %v137_v47 = vpop.f32.mrf.mxu0 }
  0xb7   :  { %v138_v48 = vadd.f32 %v992_v28, %v137_v47  ;;  %v181_v9 = vmax.f32 %v162_v8, 0.0 }
  0xb9   :  { %v173_v49 = vmax.f32 %v138_v48, 0.0 }
  0xbb   :  { %782 = vmatmul.msk.f32.gmra.mxu1 %vm195_vm1, %v173_v49 }
  0xbc   :  { %v164_v10 = vpop.f32.mrf.mxu3 }
  0xbd   :  { %v165_v11 = vadd.f32 %v992_v28, %v164_v10 }
  0xbe   :  { %v140_v51 = vpop.f32.mrf.mxu0 }
  0xbf   :  { %v141_v52 = vadd.f32 %v992_v28, %v140_v51  ;;  %v182_v12 = vmax.f32 %v165_v11, 0.0 }
  0xc1   :  { %v174_v53 = vmax.f32 %v141_v52, 0.0 }
  0xc3   :  { %783 = vmatmul.msk.f32.gmra.mxu1 %vm195_vm1, %v174_v53 }
  0xc6   :  { %v143_v54 = vpop.f32.mrf.mxu0 }
  0xc7   :  { %v144_v56 = vadd.f32 %v992_v28, %v143_v54 }
  0xc9   :  { %v175_v57 = vmax.f32 %v144_v56, 0.0 }
  0xcb   :  { %784 = vmatmul.msk.f32.vlgmr.msra.gmra.mxu2 %vm195_vm1, %v175_v57 }
  0xd3   :  { %785 = vmatmul.msk.f32.gmra.mxu2 %vm195_vm1, %v176_v59 }
  0xdb   :  { %786 = vmatmul.msk.f32.gmra.mxu2 %vm195_vm1, %v177_v62 }
  0xe3   :  { %787 = vmatmul.msk.f32.gmra.mxu2 %vm195_vm1, %v178_v1  ;;  %v319_v1 = vld [vmem:[%s1416_s1 + $0x50] sm:$0xff] }
  0xeb   :  { %788 = vmatmul.msk.f32.gmra.mxu2 %vm195_vm1, %v179_v4 }
  0xf3   :  { %789 = vmatmul.msk.f32.gmra.mxu2 %vm195_vm1, %v180_v7  ;;  %v843_v7 = vmov 32.0  }
  0xf4   :  { %809 = vrcp.f32 %v843_v7 }
  0xfa   :  { %v810_v11 = vpop.eup %809 }
  0xfb   :  { %790 = vmatmul.msk.f32.gmra.mxu2 %vm195_vm1, %v181_v9  ;;  %vm394_vm2 = vweird.f32 %v810_v11 }
 0x103   :  { %791 = vmatmul.msk.f32.gmra.mxu2 %vm195_vm1, %v182_v12 }
 0x108   :  { %v261_v14 = vpop.f32.mrf.mxu1 }
 0x109   :  { %v262_v16 = vadd.f32 %v1029_v13, %v261_v14  ;;  %v321_v14 = vld [vmem:[%s1416_s1 + $0x60] sm:$0xff] }
 0x10b   :  { %v1035_v17 = vadd.f32 %v309_v15, %v262_v16  ;;  %v390_v16 = vmul.f32 32.0, %v810_v11 }
 0x10d   :  { %v341_v18 = vsel %vm53_vm0, %v1035_v17, 0.0 }
 0x10e   :  { %342 = vadd.xlane.f32.xlu0 %v341_v18 }
 0x110   :  { %v264_v19 = vpop.f32.mrf.mxu1 }
 0x111   :  { %v265_v21 = vadd.f32 %v1029_v13, %v264_v19 }
 0x113   :  { %v1043_v22 = vadd.f32 %v310_v20, %v265_v21  ;;  %v391_v20 = vsub.f32 1.0, %v390_v16 }
 0x115   :  { %v344_v23 = vsel %vm53_vm0, %v1043_v22, 0.0 }
 0x116   :  { %345 = vadd.xlane.f32.xlu0 %v344_v23  ;;  %v322_v23 = vld [vmem:[%s1416_s1 + $0x68] sm:$0xff] }
 0x118   :  { %v267_v24 = vpop.f32.mrf.mxu1 }
 0x119   :  { %v268_v26 = vadd.f32 %v1029_v13, %v267_v24 }
 0x11b   :  { %v1051_v27 = vadd.f32 %v311_v25, %v268_v26  ;;  %v392_v25 = vmul.f32 %v810_v11, %v391_v20 }
 0x11d   :  { %v347_v28 = vsel %vm53_vm0, %v1051_v27, 0.0 }
 0x11e   :  { %348 = vadd.xlane.f32.xlu1 %v347_v28 }
 0x120   :  { %v270_v29 = vpop.f32.mrf.mxu1 }
 0x121   :  { %v271_v31 = vadd.f32 %v1029_v13, %v270_v29  ;;  %v393_v29 = vadd.f32 %v810_v11, %v392_v25 }
 0x123   :  { %v1059_v32 = vadd.f32 %v312_v30, %v271_v31  ;;  %v323_v31 = vld [vmem:[%s1416_s1 + $0x70] sm:$0xff] }
 0x125   :  { %v350_v33 = vsel %vm53_vm0, %v1059_v32, 0.0 }
 0x126   :  { %351 = vadd.xlane.f32.xlu1 %v350_v33 }
 0x128   :  { %v273_v34 = vpop.f32.mrf.mxu1 }
 0x129   :  { %v274_v36 = vadd.f32 %v1029_v13, %v273_v34  ;;  %v1147_v34 = vsel %vm394_vm2, %v810_v11, %v393_v29 }
 0x12b   :  { %v1067_v37 = vadd.f32 %v313_v35, %v274_v36 }
 0x12d   :  { %v353_v38 = vsel %vm53_vm0, %v1067_v37, 0.0 }
 0x12e   :  { %354 = vadd.xlane.f32.xlu2 %v353_v38 }
 0x130   :  { %v276_v39 = vpop.f32.mrf.mxu1 }
 0x131   :  { %v277_v41 = vadd.f32 %v1029_v13, %v276_v39 }
 0x133   :  { %v1075_v42 = vadd.f32 %v314_v40, %v277_v41 }
 0x135   :  { %v356_v43 = vsel %vm53_vm0, %v1075_v42, 0.0 }
 0x136   :  { %357 = vadd.xlane.f32.xlu2 %v356_v43 }
 0x138   :  { %v279_v44 = vpop.f32.mrf.mxu1 }
 0x139   :  { %v280_v46 = vadd.f32 %v1029_v13, %v279_v44  ;;  %v324_v44 = vld [vmem:[%s1416_s1 + $0x78] sm:$0xff] }
 0x13b   :  { %v1083_v47 = vadd.f32 %v315_v45, %v280_v46 }
 0x13d   :  { %v359_v48 = vsel %vm53_vm0, %v1083_v47, 0.0 }
 0x13e   :  { %360 = vadd.xlane.f32.xlu0 %v359_v48 }
 0x140   :  { %v282_v49 = vpop.f32.mrf.mxu1 }
 0x141   :  { %v283_v51 = vadd.f32 %v1029_v13, %v282_v49 }
 0x143   :  { %v1091_v52 = vadd.f32 %v316_v50, %v283_v51 }
 0x145   :  { %v362_v53 = vsel %vm53_vm0, %v1091_v52, 0.0 }
 0x146   :  { %363 = vadd.xlane.f32.xlu1 %v362_v53 }
 0x14e   :  { %v285_v54 = vpop.f32.mrf.mxu2 }
 0x14f   :  { %v286_v56 = vadd.f32 %v1029_v13, %v285_v54 }
 0x151   :  { %v1099_v57 = vadd.f32 %v317_v55, %v286_v56 }
 0x153   :  { %v365_v58 = vsel %vm53_vm0, %v1099_v57, 0.0 }
 0x154   :  { %366 = vadd.xlane.f32.xlu2 %v365_v58 }
 0x156   :  { %v288_v59 = vpop.f32.mrf.mxu2 }
 0x157   :  { %v289_v61 = vadd.f32 %v1029_v13, %v288_v59 }
 0x159   :  { %v1107_v62 = vadd.f32 %v318_v60, %v289_v61 }
 0x15b   :  { %v368_v63 = vsel %vm53_vm0, %v1107_v62, 0.0 }
 0x15c   :  { %369 = vadd.xlane.f32.xlu0 %v368_v63 }
 0x15e   :  { %v291_v0 = vpop.f32.mrf.mxu2 }
 0x15f   :  { %v292_v2 = vadd.f32 %v1029_v13, %v291_v0 }
 0x161   :  { %v1115_v3 = vadd.f32 %v319_v1, %v292_v2 }
 0x163   :  { %v371_v4 = vsel %vm53_vm0, %v1115_v3, 0.0 }
 0x164   :  { %372 = vadd.xlane.f32.xlu1 %v371_v4 }
 0x166   :  { %v294_v5 = vpop.f32.mrf.mxu2 }
 0x167   :  { %v295_v8 = vadd.f32 %v1029_v13, %v294_v5 }
 0x169   :  { %v1123_v9 = vadd.f32 %v320_v6, %v295_v8 }
 0x16b   :  { %v374_v10 = vsel %vm53_vm0, %v1123_v9, 0.0 }
 0x16c   :  { %375 = vadd.xlane.f32.xlu2 %v374_v10 }
 0x16e   :  { %v297_v12 = vpop.f32.mrf.mxu2 }
 0x16f   :  { %v298_v15 = vadd.f32 %v1029_v13, %v297_v12 }
 0x171   :  { %v1131_v18 = vadd.f32 %v321_v14, %v298_v15 }
 0x173   :  { %v377_v19 = vsel %vm53_vm0, %v1131_v18, 0.0 }
 0x174   :  { %378 = vadd.xlane.f32.xlu0 %v377_v19 }
 0x176   :  { %v300_v21 = vpop.f32.mrf.mxu2 }
 0x177   :  { %v301_v24 = vadd.f32 %v1029_v13, %v300_v21 }
 0x179   :  { %v1139_v26 = vadd.f32 %v322_v23, %v301_v24 }
 0x17b   :  { %v380_v28 = vsel %vm53_vm0, %v1139_v26, 0.0 }
 0x17c   :  { %381 = vadd.xlane.f32.xlu1 %v380_v28 }
 0x17e   :  { %v303_v30 = vpop.f32.mrf.mxu2 }
 0x17f   :  { %v304_v33 = vadd.f32 %v1029_v13, %v303_v30 }
 0x181   :  { %v343_v35 = vpop.xlane.xlu0 %342  ;;  %v1149_v36 = vadd.f32 %v323_v31, %v304_v33 }
 0x182   :  { %v396_v38 = vmul.f32 %v1147_v34, %v343_v35 }
 0x183   :  { %v383_v39 = vsel %vm53_vm0, %v1149_v36, 0.0 }
 0x184   :  { %v1155_v40 = vsub.f32 %v1035_v17, %v396_v38  ;;  %384 = vadd.xlane.f32.xlu2 %v383_v39 }
 0x186   :  { %v306_v41 = vpop.f32.mrf.mxu2  ;;  %v428_v43 = vmul.f32 %v1155_v40, %v1155_v40 }
 0x187   :  { %v307_v45 = vadd.f32 %v1029_v13, %v306_v41 }
 0x188   :  { %v444_v46 = vsel %vm53_vm0, %v428_v43, 0.0 }
 0x189   :  { %445 = vadd.xlane.f32.xlu1 %v444_v46  ;;  %v346_v48 = vpop.xlane.xlu0 %345  ;;  %v1164_v49 = vadd.f32 %v324_v44, %v307_v45 }
 0x18a   :  { %v397_v17 = vmul.f32 %v1147_v34, %v346_v48 }
 0x18b   :  { %v386_v50 = vsel %vm53_vm0, %v1164_v49, 0.0 }
 0x18c   :  { %v1170_v51 = vsub.f32 %v1043_v22, %v397_v17  ;;  %387 = vadd.xlane.f32.xlu0 %v386_v50 }
 0x18e   :  { %v429_v53 = vmul.f32 %v1170_v51, %v1170_v51 }
 0x190   :  { %v447_v13 = vsel %vm53_vm0, %v429_v53, 0.0 }
 0x191   :  { %v349_v54 = vpop.xlane.xlu1 %348  ;;  %448 = vadd.xlane.f32.xlu2 %v447_v13 }
 0x192   :  { %v398_v55 = vmul.f32 %v1147_v34, %v349_v54 }
 0x194   :  { %v1177_v56 = vsub.f32 %v1051_v27, %v398_v55 }
 0x196   :  { %v430_v58 = vmul.f32 %v1177_v56, %v1177_v56 }
 0x198   :  { %v450_v59 = vsel %vm53_vm0, %v430_v58, 0.0 }
 0x199   :  { %v352_v22 = vpop.xlane.xlu1 %351  ;;  %451 = vadd.xlane.f32.xlu0 %v450_v59 }
 0x19a   :  { %v399_v60 = vmul.f32 %v1147_v34, %v352_v22 }
 0x19c   :  { %v1184_v61 = vsub.f32 %v1059_v32, %v399_v60 }
 0x19e   :  { %v431_v63 = vmul.f32 %v1184_v61, %v1184_v61 }
 0x1a0   :  { %v453_v0 = vsel %vm53_vm0, %v431_v63, 0.0 }
 0x1a1   :  { %v355_v1 = vpop.xlane.xlu2 %354  ;;  %454 = vadd.xlane.f32.xlu1 %v453_v0 }
 0x1a2   :  { %v400_v27 = vmul.f32 %v1147_v34, %v355_v1 }
 0x1a4   :  { %v1191_v2 = vsub.f32 %v1067_v37, %v400_v27 }
 0x1a6   :  { %v432_v4 = vmul.f32 %v1191_v2, %v1191_v2 }
 0x1a8   :  { %v456_v5 = vsel %vm53_vm0, %v432_v4, 0.0 }
 0x1a9   :  { %v358_v6 = vpop.xlane.xlu2 %357  ;;  %457 = vadd.xlane.f32.xlu2 %v456_v5 }
 0x1aa   :  { %v401_v32 = vmul.f32 %v1147_v34, %v358_v6 }
 0x1ac   :  { %v1198_v7 = vsub.f32 %v1075_v42, %v401_v32 }
 0x1ae   :  { %v433_v8 = vmul.f32 %v1198_v7, %v1198_v7 }
 0x1b0   :  { %v459_v10 = vsel %vm53_vm0, %v433_v8, 0.0 }
 0x1b1   :  { %460 = vadd.xlane.f32.xlu0 %v459_v10  ;;  %v361_v37 = vpop.xlane.xlu0 %360 }
 0x1b2   :  { %v402_v11 = vmul.f32 %v1147_v34, %v361_v37 }
 0x1b4   :  { %v1205_v12 = vsub.f32 %v1083_v47, %v402_v11 }
 0x1b6   :  { %v434_v14 = vmul.f32 %v1205_v12, %v1205_v12 }
 0x1b8   :  { %v462_v15 = vsel %vm53_vm0, %v434_v14, 0.0 }
 0x1b9   :  { %v364_v16 = vpop.xlane.xlu1 %363  ;;  %463 = vadd.xlane.f32.xlu1 %v462_v15 }
 0x1ba   :  { %v403_v42 = vmul.f32 %v1147_v34, %v364_v16 }
 0x1bc   :  { %v1212_v19 = vsub.f32 %v1091_v52, %v403_v42 }
 0x1be   :  { %v435_v20 = vmul.f32 %v1212_v19, %v1212_v19 }
 0x1c0   :  { %v465_v21 = vsel %vm53_vm0, %v435_v20, 0.0 }
 0x1c1   :  { %466 = vadd.xlane.f32.xlu2 %v465_v21 }
 0x1c7   :  { %v367_v47 = vpop.xlane.xlu2 %366 }
 0x1c8   :  { %v404_v23 = vmul.f32 %v1147_v34, %v367_v47 }
 0x1ca   :  { %v1219_v24 = vsub.f32 %v1099_v57, %v404_v23 }
 0x1cc   :  { %v436_v25 = vmul.f32 %v1219_v24, %v1219_v24 }
 0x1ce   :  { %v468_v28 = vsel %vm53_vm0, %v436_v25, 0.0  ;;  %v1279_v25 = vld [vmem:[%s1417_s6] ss:$0 sm:$0xff] }
 0x1cf   :  { %469 = vadd.xlane.f32.xlu0 %v468_v28  ;;  %v370_v52 = vpop.xlane.xlu0 %369 }
 0x1d0   :  { %v405_v29 = vmul.f32 %v1147_v34, %v370_v52 }
 0x1d2   :  { %v1226_v30 = vsub.f32 %v1107_v62, %v405_v29  ;;  %v1284_v29 = vld [vmem:[%s1418_s7] ss:$0 sm:$0xff] }
 0x1d4   :  { %v437_v31 = vmul.f32 %v1226_v30, %v1226_v30 }
 0x1d6   :  { %v471_v33 = vsel %vm53_vm0, %v437_v31, 0.0 }
 0x1d7   :  { %v373_v35 = vpop.xlane.xlu1 %372  ;;  %472 = vadd.xlane.f32.xlu1 %v471_v33 }
 0x1d8   :  { %v406_v57 = vmul.f32 %v1147_v34, %v373_v35 }
 0x1da   :  { %v1233_v38 = vsub.f32 %v1115_v3, %v406_v57 }
 0x1dc   :  { %v438_v39 = vmul.f32 %v1233_v38, %v1233_v38 }
 0x1de   :  { %v474_v41 = vsel %vm53_vm0, %v438_v39, 0.0 }
 0x1df   :  { %v376_v43 = vpop.xlane.xlu2 %375  ;;  %475 = vadd.xlane.f32.xlu2 %v474_v41 }
 0x1e0   :  { %v407_v62 = vmul.f32 %v1147_v34, %v376_v43 }
 0x1e2   :  { %v1240_v44 = vsub.f32 %v1123_v9, %v407_v62 }
 0x1e4   :  { %v439_v45 = vmul.f32 %v1240_v44, %v1240_v44 }
 0x1e6   :  { %v477_v46 = vsel %vm53_vm0, %v439_v45, 0.0 }
 0x1e7   :  { %478 = vadd.xlane.f32.xlu0 %v477_v46  ;;  %v379_v3 = vpop.xlane.xlu0 %378 }
 0x1e8   :  { %v408_v48 = vmul.f32 %v1147_v34, %v379_v3 }
 0x1ea   :  { %v1247_v17 = vsub.f32 %v1131_v18, %v408_v48 }
 0x1ec   :  { %v440_v50 = vmul.f32 %v1247_v17, %v1247_v17 }
 0x1ee   :  { %v480_v53 = vsel %vm53_vm0, %v440_v50, 0.0 }
 0x1ef   :  { %v382_v13 = vpop.xlane.xlu1 %381  ;;  %481 = vadd.xlane.f32.xlu1 %v480_v53 }
 0x1f0   :  { %v409_v9 = vmul.f32 %v1147_v34, %v382_v13 }
 0x1f2   :  { %v1254_v54 = vsub.f32 %v1139_v26, %v409_v9 }
 0x1f4   :  { %v441_v55 = vmul.f32 %v1254_v54, %v1254_v54 }
 0x1f6   :  { %v483_v58 = vsel %vm53_vm0, %v441_v55, 0.0 }
 0x1f7   :  { %v385_v59 = vpop.xlane.xlu2 %384  ;;  %484 = vadd.xlane.f32.xlu2 %v483_v58 }
 0x1f8   :  { %v410_v18 = vmul.f32 %v1147_v34, %v385_v59 }
 0x1fa   :  { %v1261_v22 = vsub.f32 %v1149_v36, %v410_v18 }
 0x1fc   :  { %v446_v60 = vpop.xlane.xlu1 %445  ;;  %v442_v63 = vmul.f32 %v1261_v22, %v1261_v22 }
 0x1fd   :  { %v492_v0 = vmul.f32 %v446_v60, %v1147_v34 }
 0x1fe   :  { %v486_v26 = vsel %vm53_vm0, %v442_v63, 0.0 }
 0x1ff   :  { %v508_v1 = vadd.f32 1e-05, %v492_v0  ;;  %487 = vadd.xlane.f32.xlu0 %v486_v26  ;;  %v388_v27 = vpop.xlane.xlu0 %387 }
 0x200   :  { %v411_v4 = vmul.f32 %v1147_v34, %v388_v27 }
 0x201   :  { %811 = vrsqrt.f32 %v508_v1  ;;  %vm530_vm4 = vweird.f32 %v508_v1 }
 0x202   :  { %v1269_v5 = vsub.f32 %v1164_v49, %v411_v4 }
 0x204   :  { %v449_v6 = vpop.xlane.xlu2 %448  ;;  %v443_v36 = vmul.f32 %v1269_v5, %v1269_v5 }
 0x205   :  { %v493_v32 = vmul.f32 %v449_v6, %v1147_v34 }
 0x206   :  { %v489_v8 = vsel %vm53_vm0, %v443_v36, 0.0 }
 0x207   :  { %v812_v10 = vpop.eup %811  ;;  %v509_v37 = vadd.f32 1e-05, %v493_v32  ;;  %490 = vadd.xlane.f32.xlu1 %v489_v8 }
 0x208   :  { %v525_v11 = vmul.f32 %v812_v10, %v508_v1  ;;  %vm531_vm3 = vweird.f32 %v812_v10 }
 0x209   :  { %813 = vrsqrt.f32 %v509_v37  ;;  %vm532_vm5 = vmor %vm530_vm4, %vm531_vm3  ;;  %vm540_vm7 = vweird.f32 %v509_v37 }
 0x20a   :  { %v526_v14 = vmul.f32 %v812_v10, %v525_v11 }
 0x20c   :  { %v527_v15 = vmul.f32 0.5, %v526_v14  ;;  %v452_v16 = vpop.xlane.xlu0 %451 }
 0x20d   :  { %v494_v42 = vmul.f32 %v452_v16, %v1147_v34 }
 0x20e   :  { %v528_v49 = vsub.f32 1.5, %v527_v15 }
 0x20f   :  { %v814_v20 = vpop.eup %813  ;;  %v510_v21 = vadd.f32 1e-05, %v494_v42 }
 0x210   :  { %v529_v47 = vmul.f32 %v812_v10, %v528_v49  ;;  %v535_v23 = vmul.f32 %v814_v20, %v509_v37  ;;  %vm541_vm6 = vweird.f32 %v814_v20 }
 0x211   :  { %815 = vrsqrt.f32 %v510_v21  ;;  %vm542_vm8 = vmor %vm540_vm7, %vm541_vm6  ;;  %vm550_vm10 = vweird.f32 %v510_v21 }
 0x212   :  { %v533_v28 = vsel %vm532_vm5, %v812_v10, %v529_v47  ;;  %v536_v52 = vmul.f32 %v814_v20, %v535_v23 }
 0x213   :  { %v684_v31 = vmul.f32 %v533_v28, %v1155_v40 }
 0x214   :  { %v537_v33 = vmul.f32 0.5, %v536_v52  ;;  %v455_v35 = vpop.xlane.xlu1 %454 }
 0x215   :  { %v704_v57 = vmul.f32 %v1279_v25, %v684_v31  ;;  %v495_v39 = vmul.f32 %v455_v35, %v1147_v34 }
 0x216   :  { %v538_v41 = vsub.f32 1.5, %v537_v33 }
 0x217   :  { %v816_v43 = vpop.eup %815  ;;  %v724_v62 = vadd.f32 %v1284_v29, %v704_v57  ;;  %v511_v45 = vadd.f32 1e-05, %v495_v39 }
 0x218   :  { %v539_v46 = vmul.f32 %v814_v20, %v538_v41  ;;  %v545_v3 = vmul.f32 %v816_v43, %v510_v21  ;;  %vm551_vm9 = vweird.f32 %v816_v43 }
 0x219   :  { %740 = vst.msk [vmem:[%s1419_s8] sm:$0xff] %vm53_vm0, %v724_v62  ;;  %817 = vrsqrt.f32 %v511_v45  ;;  %vm552_vm11 = vmor %vm550_vm10, %vm551_vm9  ;;  %vm560_vm13 = vweird.f32 %v511_v45 }
 0x21a   :  { %v543_v40 = vsel %vm542_vm8, %v814_v20, %v539_v46  ;;  %v546_v48 = vmul.f32 %v816_v43, %v545_v3 }
 0x21b   :  { %v685_v50 = vmul.f32 %v543_v40, %v1170_v51 }
 0x21c   :  { %v547_v53 = vmul.f32 0.5, %v546_v48  ;;  %v458_v13 = vpop.xlane.xlu2 %457 }
 0x21d   :  { %v705_v9 = vmul.f32 %v1279_v25, %v685_v50  ;;  %v496_v55 = vmul.f32 %v458_v13, %v1147_v34 }
 0x21e   :  { %v548_v58 = vsub.f32 1.5, %v547_v53 }
 0x21f   :  { %v818_v59 = vpop.eup %817  ;;  %v725_v18 = vadd.f32 %v1284_v29, %v705_v9  ;;  %v512_v60 = vadd.f32 1e-05, %v496_v55 }
 0x220   :  { %v549_v63 = vmul.f32 %v816_v43, %v548_v58  ;;  %v555_v0 = vmul.f32 %v818_v59, %v511_v45  ;;  %vm561_vm12 = vweird.f32 %v818_v59 }
 0x221   :  { %741 = vst.msk [vmem:[%s1419_s8 + $0x8] sm:$0xff] %vm53_vm0, %v725_v18  ;;  %819 = vrsqrt.f32 %v512_v60  ;;  %vm562_vm14 = vmor %vm560_vm13, %vm561_vm12  ;;  %vm570_vm1 = vweird.f32 %v512_v60 }
 0x222   :  { %v553_v51 = vsel %vm552_vm11, %v816_v43, %v549_v63  ;;  %v556_v26 = vmul.f32 %v818_v59, %v555_v0 }
 0x223   :  { %v686_v1 = vmul.f32 %v553_v51, %v1177_v56 }
 0x224   :  { %v557_v27 = vmul.f32 0.5, %v556_v26  ;;  %v461_v4 = vpop.xlane.xlu0 %460 }
 0x225   :  { %v706_v6 = vmul.f32 %v1279_v25, %v686_v1  ;;  %v497_v36 = vmul.f32 %v461_v4, %v1147_v34 }
 0x226   :  { %v558_v32 = vsub.f32 1.5, %v557_v27 }
 0x227   :  { %v820_v8 = vpop.eup %819  ;;  %v726_v10 = vadd.f32 %v1284_v29, %v706_v6  ;;  %v513_v37 = vadd.f32 1e-05, %v497_v36 }
 0x228   :  { %v559_v11 = vmul.f32 %v818_v59, %v558_v32  ;;  %v565_v14 = vmul.f32 %v820_v8, %v512_v60  ;;  %vm571_vm15 = vweird.f32 %v820_v8 }
 0x229   :  { %742 = vst.msk [vmem:[%s1419_s8 + $0x10] sm:$0xff] %vm53_vm0, %v726_v10  ;;  %821 = vrsqrt.f32 %v513_v37  ;;  %vm572_vm2 = vmor %vm570_vm1, %vm571_vm15  ;;  %vm580_vm4 = vweird.f32 %v513_v37 }
 0x22a   :  { %v563_v56 = vsel %vm562_vm14, %v818_v59, %v559_v11  ;;  %v566_v15 = vmul.f32 %v820_v8, %v565_v14 }
 0x22b   :  { %v687_v16 = vmul.f32 %v563_v56, %v1184_v61 }
 0x22c   :  { %v567_v42 = vmul.f32 0.5, %v566_v15  ;;  %v464_v49 = vpop.xlane.xlu1 %463 }
 0x22d   :  { %v707_v20 = vmul.f32 %v1279_v25, %v687_v16  ;;  %v498_v21 = vmul.f32 %v464_v49, %v1147_v34 }
 0x22e   :  { %v568_v47 = vsub.f32 1.5, %v567_v42 }
 0x22f   :  { %v822_v23 = vpop.eup %821  ;;  %v727_v28 = vadd.f32 %v1284_v29, %v707_v20  ;;  %v514_v52 = vadd.f32 1e-05, %v498_v21 }
 0x230   :  { %v569_v31 = vmul.f32 %v820_v8, %v568_v47  ;;  %v575_v33 = vmul.f32 %v822_v23, %v513_v37  ;;  %vm581_vm3 = vweird.f32 %v822_v23 }
 0x231   :  { %743 = vst.msk [vmem:[%s1419_s8 + $0x18] sm:$0xff] %vm53_vm0, %v727_v28  ;;  %823 = vrsqrt.f32 %v514_v52  ;;  %vm582_vm5 = vmor %vm580_vm4, %vm581_vm3  ;;  %vm590_vm7 = vweird.f32 %v514_v52 }
 0x232   :  { %v573_v61 = vsel %vm572_vm2, %v820_v8, %v569_v31  ;;  %v576_v35 = vmul.f32 %v822_v23, %v575_v33 }
 0x233   :  { %v688_v57 = vmul.f32 %v573_v61, %v1191_v2 }
 0x234   :  { %v577_v39 = vmul.f32 0.5, %v576_v35  ;;  %v467_v41 = vpop.xlane.xlu2 %466 }
 0x235   :  { %v708_v43 = vmul.f32 %v1279_v25, %v688_v57  ;;  %v499_v62 = vmul.f32 %v467_v41, %v1147_v34 }
 0x236   :  { %v578_v45 = vsub.f32 1.5, %v577_v39 }
 0x237   :  { %v824_v46 = vpop.eup %823  ;;  %v728_v3 = vadd.f32 %v1284_v29, %v708_v43  ;;  %v515_v40 = vadd.f32 1e-05, %v499_v62 }
 0x238   :  { %v579_v48 = vmul.f32 %v822_v23, %v578_v45  ;;  %v585_v50 = vmul.f32 %v824_v46, %v514_v52  ;;  %vm591_vm6 = vweird.f32 %v824_v46 }
 0x239   :  { %744 = vst.msk [vmem:[%s1419_s8 + $0x20] sm:$0xff] %vm53_vm0, %v728_v3  ;;  %825 = vrsqrt.f32 %v515_v40  ;;  %vm592_vm8 = vmor %vm590_vm7, %vm591_vm6  ;;  %vm600_vm10 = vweird.f32 %v515_v40 }
 0x23a   :  { %v583_v2 = vsel %vm582_vm5, %v822_v23, %v579_v48  ;;  %v586_v53 = vmul.f32 %v824_v46, %v585_v50 }
 0x23b   :  { %v689_v13 = vmul.f32 %v583_v2, %v1198_v7 }
 0x23c   :  { %v587_v9 = vmul.f32 0.5, %v586_v53 }
 0x23d   :  { %v709_v55 = vmul.f32 %v1279_v25, %v689_v13 }
 0x23e   :  { %v588_v58 = vsub.f32 1.5, %v587_v9 }
 0x23f   :  { %v826_v59 = vpop.eup %825  ;;  %v729_v18 = vadd.f32 %v1284_v29, %v709_v55 }
 0x240   :  { %v589_v60 = vmul.f32 %v824_v46, %v588_v58  ;;  %v595_v63 = vmul.f32 %v826_v59, %v515_v40  ;;  %vm601_vm9 = vweird.f32 %v826_v59 }
 0x241   :  { %745 = vst.msk [vmem:[%s1419_s8 + $0x28] sm:$0xff] %vm53_vm0, %v729_v18  ;;  %vm602_vm11 = vmor %vm600_vm10, %vm601_vm9 }
 0x242   :  { %v593_v0 = vsel %vm592_vm8, %v824_v46, %v589_v60  ;;  %v596_v51 = vmul.f32 %v826_v59, %v595_v63  ;;  %v470_v7 = vpop.xlane.xlu0 %469 }
 0x243   :  { %v690_v26 = vmul.f32 %v593_v0, %v1205_v12  ;;  %v500_v1 = vmul.f32 %v470_v7, %v1147_v34 }
 0x244   :  { %v597_v27 = vmul.f32 0.5, %v596_v51 }
 0x245   :  { %v710_v4 = vmul.f32 %v1279_v25, %v690_v26  ;;  %v516_v6 = vadd.f32 1e-05, %v500_v1 }
 0x246   :  { %v598_v36 = vsub.f32 1.5, %v597_v27 }
 0x247   :  { %v730_v32 = vadd.f32 %v1284_v29, %v710_v4  ;;  %827 = vrsqrt.f32 %v516_v6  ;;  %vm610_vm13 = vweird.f32 %v516_v6 }
 0x248   :  { %v599_v8 = vmul.f32 %v826_v59, %v598_v36 }
 0x249   :  { %746 = vst.msk [vmem:[%s1419_s8 + $0x30] sm:$0xff] %vm53_vm0, %v730_v32 }
 0x24a   :  { %v603_v12 = vsel %vm602_vm11, %v826_v59, %v599_v8  ;;  %v473_v10 = vpop.xlane.xlu1 %472 }
 0x24b   :  { %v691_v37 = vmul.f32 %v603_v12, %v1212_v19  ;;  %v501_v11 = vmul.f32 %v473_v10, %v1147_v34 }
 0x24d   :  { %v828_v14 = vpop.eup %827  ;;  %v711_v56 = vmul.f32 %v1279_v25, %v691_v37  ;;  %v517_v15 = vadd.f32 1e-05, %v501_v11 }
 0x24e   :  { %v605_v16 = vmul.f32 %v828_v14, %v516_v6  ;;  %vm611_vm12 = vweird.f32 %v828_v14 }
 0x24f   :  { %v731_v42 = vadd.f32 %v1284_v29, %v711_v56  ;;  %829 = vrsqrt.f32 %v517_v15  ;;  %vm612_vm14 = vmor %vm610_vm13, %vm611_vm12  ;;  %vm620_vm1 = vweird.f32 %v517_v15 }
 0x250   :  { %v606_v49 = vmul.f32 %v828_v14, %v605_v16 }
 0x251   :  { %747 = vst.msk [vmem:[%s1419_s8 + $0x38] sm:$0xff] %vm53_vm0, %v731_v42 }
 0x252   :  { %v607_v20 = vmul.f32 0.5, %v606_v49  ;;  %v476_v21 = vpop.xlane.xlu2 %475 }
 0x253   :  { %v502_v19 = vmul.f32 %v476_v21, %v1147_v34 }
 0x254   :  { %v608_v47 = vsub.f32 1.5, %v607_v20 }
 0x255   :  { %v830_v23 = vpop.eup %829  ;;  %v518_v28 = vadd.f32 1e-05, %v502_v19 }
 0x256   :  { %v609_v52 = vmul.f32 %v828_v14, %v608_v47  ;;  %v615_v31 = vmul.f32 %v830_v23, %v517_v15  ;;  %vm621_vm15 = vweird.f32 %v830_v23 }
 0x257   :  { %831 = vrsqrt.f32 %v518_v28  ;;  %vm622_vm2 = vmor %vm620_vm1, %vm621_vm15  ;;  %vm630_vm4 = vweird.f32 %v518_v28 }
 0x258   :  { %v613_v33 = vsel %vm612_vm14, %v828_v14, %v609_v52  ;;  %v616_v61 = vmul.f32 %v830_v23, %v615_v31 }
 0x259   :  { %v692_v35 = vmul.f32 %v613_v33, %v1219_v24 }
 0x25a   :  { %v617_v57 = vmul.f32 0.5, %v616_v61  ;;  %v479_v39 = vpop.xlane.xlu0 %478 }
 0x25b   :  { %v712_v41 = vmul.f32 %v1279_v25, %v692_v35  ;;  %v503_v43 = vmul.f32 %v479_v39, %v1147_v34 }
 0x25c   :  { %v618_v62 = vsub.f32 1.5, %v617_v57 }
 0x25d   :  { %v832_v45 = vpop.eup %831  ;;  %v732_v46 = vadd.f32 %v1284_v29, %v712_v41  ;;  %v519_v3 = vadd.f32 1e-05, %v503_v43 }
 0x25e   :  { %v619_v40 = vmul.f32 %v830_v23, %v618_v62  ;;  %v625_v48 = vmul.f32 %v832_v45, %v518_v28  ;;  %vm631_vm3 = vweird.f32 %v832_v45 }
 0x25f   :  { %748 = vst.msk [vmem:[%s1419_s8 + $0x40] sm:$0xff] %vm53_vm0, %v732_v46  ;;  %833 = vrsqrt.f32 %v519_v3  ;;  %vm632_vm5 = vmor %vm630_vm4, %vm631_vm3  ;;  %vm640_vm7 = vweird.f32 %v519_v3 }
 0x260   :  { %v623_v24 = vsel %vm622_vm2, %v830_v23, %v619_v40  ;;  %v626_v50 = vmul.f32 %v832_v45, %v625_v48 }
 0x261   :  { %v693_v2 = vmul.f32 %v623_v24, %v1226_v30 }
 0x262   :  { %v627_v53 = vmul.f32 0.5, %v626_v50  ;;  %v482_v13 = vpop.xlane.xlu1 %481 }
 0x263   :  { %v713_v9 = vmul.f32 %v1279_v25, %v693_v2  ;;  %v504_v55 = vmul.f32 %v482_v13, %v1147_v34 }
 0x264   :  { %v628_v58 = vsub.f32 1.5, %v627_v53 }
 0x265   :  { %v834_v59 = vpop.eup %833  ;;  %v733_v18 = vadd.f32 %v1284_v29, %v713_v9  ;;  %v520_v60 = vadd.f32 1e-05, %v504_v55 }
 0x266   :  { %v629_v63 = vmul.f32 %v832_v45, %v628_v58  ;;  %v635_v0 = vmul.f32 %v834_v59, %v519_v3  ;;  %vm641_vm6 = vweird.f32 %v834_v59 }
 0x267   :  { %749 = vst.msk [vmem:[%s1419_s8 + $0x48] sm:$0xff] %vm53_vm0, %v733_v18  ;;  %835 = vrsqrt.f32 %v520_v60  ;;  %vm642_vm8 = vmor %vm640_vm7, %vm641_vm6  ;;  %vm650_vm10 = vweird.f32 %v520_v60 }
 0x268   :  { %v633_v30 = vsel %vm632_vm5, %v832_v45, %v629_v63  ;;  %v636_v51 = vmul.f32 %v834_v59, %v635_v0 }
 0x269   :  { %v694_v7 = vmul.f32 %v633_v30, %v1233_v38 }
 0x26a   :  { %v637_v26 = vmul.f32 0.5, %v636_v51  ;;  %v485_v1 = vpop.xlane.xlu2 %484 }
 0x26b   :  { %v714_v27 = vmul.f32 %v1279_v25, %v694_v7  ;;  %v505_v4 = vmul.f32 %v485_v1, %v1147_v34 }
 0x26c   :  { %v638_v6 = vsub.f32 1.5, %v637_v26 }
 0x26d   :  { %v836_v36 = vpop.eup %835  ;;  %v734_v32 = vadd.f32 %v1284_v29, %v714_v27  ;;  %v521_v8 = vadd.f32 1e-05, %v505_v4 }
 0x26e   :  { %v639_v12 = vmul.f32 %v834_v59, %v638_v6  ;;  %v645_v10 = vmul.f32 %v836_v36, %v520_v60  ;;  %vm651_vm9 = vweird.f32 %v836_v36 }
 0x26f   :  { %750 = vst.msk [vmem:[%s1419_s8 + $0x50] sm:$0xff] %vm53_vm0, %v734_v32  ;;  %837 = vrsqrt.f32 %v521_v8  ;;  %vm652_vm11 = vmor %vm650_vm10, %vm651_vm9  ;;  %vm660_vm13 = vweird.f32 %v521_v8 }
 0x270   :  { %v643_v38 = vsel %vm642_vm8, %v834_v59, %v639_v12  ;;  %v646_v37 = vmul.f32 %v836_v36, %v645_v10 }
 0x271   :  { %v695_v11 = vmul.f32 %v643_v38, %v1240_v44 }
 0x272   :  { %v647_v14 = vmul.f32 0.5, %v646_v37  ;;  %v488_v56 = vpop.xlane.xlu0 %487 }
 0x273   :  { %v715_v15 = vmul.f32 %v1279_v25, %v695_v11  ;;  %v506_v16 = vmul.f32 %v488_v56, %v1147_v34 }
 0x274   :  { %v648_v42 = vsub.f32 1.5, %v647_v14 }
 0x275   :  { %v838_v49 = vpop.eup %837  ;;  %v735_v20 = vadd.f32 %v1284_v29, %v715_v15  ;;  %v522_v21 = vadd.f32 1e-05, %v506_v16 }
 0x276   :  { %v649_v19 = vmul.f32 %v836_v36, %v648_v42  ;;  %v655_v47 = vmul.f32 %v838_v49, %v521_v8  ;;  %vm661_vm12 = vweird.f32 %v838_v49 }
 0x277   :  { %751 = vst.msk [vmem:[%s1419_s8 + $0x58] sm:$0xff] %vm53_vm0, %v735_v20  ;;  %839 = vrsqrt.f32 %v522_v21  ;;  %vm662_vm14 = vmor %vm660_vm13, %vm661_vm12  ;;  %vm670_vm1 = vweird.f32 %v522_v21 }
 0x278   :  { %v653_v44 = vsel %vm652_vm11, %v836_v36, %v649_v19  ;;  %v656_v23 = vmul.f32 %v838_v49, %v655_v47 }
 0x279   :  { %v696_v28 = vmul.f32 %v653_v44, %v1247_v17 }
 0x27a   :  { %v657_v52 = vmul.f32 0.5, %v656_v23  ;;  %v491_v31 = vpop.xlane.xlu1 %490 }
 0x27b   :  { %v716_v33 = vmul.f32 %v1279_v25, %v696_v28  ;;  %v507_v61 = vmul.f32 %v491_v31, %v1147_v34 }
 0x27c   :  { %v658_v35 = vsub.f32 1.5, %v657_v52 }
 0x27d   :  { %v840_v57 = vpop.eup %839  ;;  %v736_v39 = vadd.f32 %v1284_v29, %v716_v33  ;;  %v523_v41 = vadd.f32 1e-05, %v507_v61 }
 0x27e   :  { %v659_v43 = vmul.f32 %v838_v49, %v658_v35  ;;  %v665_v62 = vmul.f32 %v840_v57, %v522_v21  ;;  %vm671_vm15 = vweird.f32 %v840_v57 }
 0x27f   :  { %752 = vst.msk [vmem:[%s1419_s8 + $0x60] sm:$0xff] %vm53_vm0, %v736_v39  ;;  %841 = vrsqrt.f32 %v523_v41  ;;  %vm672_vm2 = vmor %vm670_vm1, %vm671_vm15  ;;  %vm680_vm4 = vweird.f32 %v523_v41 }
 0x280   :  { %v663_v17 = vsel %vm662_vm14, %v838_v49, %v659_v43  ;;  %v666_v45 = vmul.f32 %v840_v57, %v665_v62 }
 0x281   :  { %v697_v34 = vmul.f32 %v663_v17, %v1254_v54 }
 0x282   :  { %v667_v46 = vmul.f32 0.5, %v666_v45 }
 0x283   :  { %v717_v3 = vmul.f32 %v1279_v25, %v697_v34 }
 0x284   :  { %v668_v40 = vsub.f32 1.5, %v667_v46 }
 0x285   :  { %v842_v48 = vpop.eup %841  ;;  %v737_v24 = vadd.f32 %v1284_v29, %v717_v3 }
 0x286   :  { %v669_v50 = vmul.f32 %v840_v57, %v668_v40  ;;  %v675_v2 = vmul.f32 %v842_v48, %v523_v41  ;;  %vm681_vm3 = vweird.f32 %v842_v48 }
 0x287   :  { %753 = vst.msk [vmem:[%s1419_s8 + $0x68] sm:$0xff] %vm53_vm0, %v737_v24  ;;  %vm682_vm5 = vmor %vm680_vm4, %vm681_vm3 }
 0x288   :  { %v673_v53 = vsel %vm672_vm2, %v840_v57, %v669_v50  ;;  %v676_v13 = vmul.f32 %v842_v48, %v675_v2 }
 0x289   :  { %v698_v54 = vmul.f32 %v673_v53, %v1261_v22 }
 0x28a   :  { %v677_v9 = vmul.f32 0.5, %v676_v13 }
 0x28b   :  { %v718_v55 = vmul.f32 %v1279_v25, %v698_v54 }
 0x28c   :  { %v678_v58 = vsub.f32 1.5, %v677_v9 }
 0x28d   :  { %v738_v59 = vadd.f32 %v1284_v29, %v718_v55 }
 0x28e   :  { %v679_v18 = vmul.f32 %v842_v48, %v678_v58 }
 0x28f   :  { %754 = vst.msk [vmem:[%s1419_s8 + $0x70] sm:$0xff] %vm53_vm0, %v738_v59 }
 0x290   :  { %v683_v60 = vsel %vm682_vm5, %v842_v48, %v679_v18 }
 0x291   :  { %v699_v63 = vmul.f32 %v683_v60, %v1269_v5 }
 0x293   :  { %v719_v22 = vmul.f32 %v1279_v25, %v699_v63 }
 0x295   :  { %v739_v0 = vadd.f32 %v1284_v29, %v719_v22 }
 0x297   :  { %755 = vst.msk [vmem:[%s1419_s8 + $0x78] sm:$0xff] %vm53_vm0, %v739_v0 }

// kernel: block_self_forward.4
= control target key start
LH: loop header
LB: loop body
LE: loop exit
PB: predicated region body
PF: predicated region fallthrough
CT: control target
= control target key end

     0   :  { %s1923_s15 = smov 0   ;;  %s2228_s0 = inlined_call_operand.vmem [shape: f32[2,8,8,32], index: 0, kind: input, shape index: {}]   ;;  %s2229_s1 = inlined_call_operand.vmem [shape: f32[2,8,32,8], index: 1, kind: input, shape index: {}]   ;;  %s2230_s2 = inlined_call_operand.vmem [shape: f32[2,8,32,8], index: 2, kind: input, shape index: {}]   ;;  %s2231_s3 = inlined_call_operand.vmem [shape: f32[8,8,8], index: 3, kind: input, shape index: {}]   ;;  %s2232_s4 = inlined_call_operand.vmem [shape: f32[2,8,8,32], index: 4, kind: output, shape index: {}]  }
   0x1 LB: > { %s1719_s16 = sadd.s32 4294967295, %s1896_s15   ;;  %p1723_p0 = scmp.ge.s32.totalorder %s1896_s15, 1  ;;  %s1896_s15 = sphi %s1923_s15, %s14_s15  }
   0x2   : > { %p182_p1 = scmp.lt.s32.totalorder %s1896_s15, 3 }
   0x4   : > { %p183_p2 = pnand %p1723_p0, %p182_p1 }
   0x5   : > { %p218_p3 = scmp.lt.s32.totalorder (!%p183_p2), %s1719_s16, 1 }
   0x6   : > { %186 = sbr.rel (%p183_p2) target bundleno = 749 (0x2ed), region = 36 }
   0xb   : > { %v310_v0 = vld [vmem:[%s2231_s3] sm:$0xff]  ;;  %v311_v1 = vld [vmem:[%s2231_s3 + $0x8] sm:$0xff]  ;;  %v312_v2 = vld [vmem:[%s2231_s3 + $0x10] sm:$0xff]  ;;  %s2234_s16 = smov (!%p218_p3, %s1719_s16), 1  ;;  %vm318_vm0 = vcmask 64512   ;;  %vm975_vm1 = vcmask 261120  }
   0xc   : > { %346 = vmatpush.msra.mxu0 %v310_v0  ;;  %387 = vmatpush.msra.mxu1 %v311_v1  ;;  %v313_v3 = vld [vmem:[%s2231_s3 + $0x18] sm:$0xff]  ;;  %v316_v4 = vld [vmem:[%s2231_s3 + $0x30] sm:$0xff]  ;;  %v314_v6 = vld [vmem:[%s2231_s3 + $0x20] sm:$0xff]  ;;  %s1847_s7 = sshll.u32 %s2234_s16, 8  ;;  %s1846_s14 = sshll.u32 %s2234_s16, 6 }
   0xd   : > { %v317_v5 = vld [vmem:[%s2231_s3 + $0x38] sm:$0xff]  ;;  %428 = vmatpush.msra.mxu2 %v312_v2  ;;  %469 = vmatpush.msra.mxu3 %v313_v3  ;;  %v315_v7 = vld [vmem:[%s2231_s3 + $0x28] sm:$0xff]  ;;  %s1963_s10 = scalar_lea.vmem %s2229_s1, %s1847_s7  ;;  %s2034_s13 = scalar_lea.vmem %s2230_s2, %s1847_s7 }
   0xe   : > { %510 = vmatpush.msrb.mxu0 %v314_v6  ;;  %551 = vmatpush.msrb.mxu1 %v315_v7  ;;  %v246_v8 = vld [vmem:[%s1963_s10] sm:$0xff]  ;;  %v247_v12 = vld [vmem:[%s1963_s10 + $0x8] sm:$0xff]  ;;  %v248_v16 = vld [vmem:[%s1963_s10 + $0x10] sm:$0xff]  ;;  %s2106_s19 = scalar_lea.vmem %s2228_s0, %s1846_s14  ;;  %s237_s22 = scalar_lea.vmem %s2232_s4, %s1846_s14 }
   0xf   : > { %592 = vmatpush.msrb.mxu2 %v316_v4  ;;  %633 = vmatpush.msrb.mxu3 %v317_v5  ;;  %v250_v9 = vld [vmem:[%s1963_s10 + $0x20] sm:$0xff]  ;;  %v251_v13 = vld [vmem:[%s1963_s10 + $0x28] sm:$0xff]  ;;  %v252_v17 = vld [vmem:[%s1963_s10 + $0x30] sm:$0xff] }
  0x10   : > { %v254_v10 = vld [vmem:[%s1963_s10 + $0x40] sm:$0xff]  ;;  %1732 = vmatmul.msk.f32.vlgmr.msra.gmra.mxu0 %vm318_vm0, %v246_v8  ;;  %1736 = vmatmul.msk.f32.vlgmr.msra.gmra.mxu1 %vm318_vm0, %v250_v9  ;;  %v255_v14 = vld [vmem:[%s1963_s10 + $0x48] sm:$0xff]  ;;  %v256_v18 = vld [vmem:[%s1963_s10 + $0x50] sm:$0xff] }
  0x11   : > { %v258_v11 = vld [vmem:[%s1963_s10 + $0x60] sm:$0xff]  ;;  %1740 = vmatmul.msk.f32.vlgmr.msra.gmra.mxu2 %vm318_vm0, %v254_v10  ;;  %674 = vmatpush.msra.mxu0 %v310_v0  ;;  %v259_v15 = vld [vmem:[%s1963_s10 + $0x68] sm:$0xff]  ;;  %v260_v19 = vld [vmem:[%s1963_s10 + $0x70] sm:$0xff] }
  0x12   : > { %1744 = vmatmul.msk.f32.vlgmr.msra.gmra.mxu3 %vm318_vm0, %v258_v11  ;;  %756 = vmatpush.msra.mxu2 %v312_v2  ;;  %v249_v20 = vld [vmem:[%s1963_s10 + $0x18] sm:$0xff]  ;;  %v262_v24 = vld [vmem:[%s1963_s10 + $0x80] sm:$0xff]  ;;  %v263_v28 = vld [vmem:[%s1963_s10 + $0x88] sm:$0xff] }
  0x13   : > { %797 = vmatpush.msra.mxu3 %v313_v3  ;;  %715 = vmatpush.msra.mxu1 %v311_v1  ;;  %v253_v21 = vld [vmem:[%s1963_s10 + $0x38] sm:$0xff]  ;;  %v266_v25 = vld [vmem:[%s1963_s10 + $0xa0] sm:$0xff]  ;;  %v267_v29 = vld [vmem:[%s1963_s10 + $0xa8] sm:$0xff] }
  0x14   : > { %v257_v22 = vld [vmem:[%s1963_s10 + $0x58] sm:$0xff]  ;;  %v270_v26 = vld [vmem:[%s1963_s10 + $0xc0] sm:$0xff]  ;;  %v271_v30 = vld [vmem:[%s1963_s10 + $0xc8] sm:$0xff] }
  0x15   : > { %v261_v23 = vld [vmem:[%s1963_s10 + $0x78] sm:$0xff]  ;;  %v274_v27 = vld [vmem:[%s1963_s10 + $0xe0] sm:$0xff]  ;;  %v275_v31 = vld [vmem:[%s1963_s10 + $0xe8] sm:$0xff] }
  0x16   : > { %v264_v32 = vld [vmem:[%s1963_s10 + $0x90] sm:$0xff]  ;;  %v265_v36 = vld [vmem:[%s1963_s10 + $0x98] sm:$0xff]  ;;  %v278_v40 = vld [vmem:[%s2034_s13] sm:$0xff] }
  0x17   : > { %v268_v33 = vld [vmem:[%s1963_s10 + $0xb0] sm:$0xff]  ;;  %v269_v37 = vld [vmem:[%s1963_s10 + $0xb8] sm:$0xff]  ;;  %v282_v41 = vld [vmem:[%s2034_s13 + $0x20] sm:$0xff] }
  0x18   : > { %1733 = vmatmul.msk.f32.gmra.mxu0 %vm318_vm0, %v247_v12  ;;  %1737 = vmatmul.msk.f32.gmra.mxu1 %vm318_vm0, %v251_v13  ;;  %v272_v34 = vld [vmem:[%s1963_s10 + $0xd0] sm:$0xff]  ;;  %v273_v38 = vld [vmem:[%s1963_s10 + $0xd8] sm:$0xff]  ;;  %v286_v42 = vld [vmem:[%s2034_s13 + $0x40] sm:$0xff] }
  0x19   : > { %1741 = vmatmul.msk.f32.gmra.mxu2 %vm318_vm0, %v255_v14  ;;  %v276_v35 = vld [vmem:[%s1963_s10 + $0xf0] sm:$0xff]  ;;  %v277_v39 = vld [vmem:[%s1963_s10 + $0xf8] sm:$0xff]  ;;  %v290_v43 = vld [vmem:[%s2034_s13 + $0x60] sm:$0xff] }
  0x1a   : > { %1745 = vmatmul.msk.f32.gmra.mxu3 %vm318_vm0, %v259_v15  ;;  %v279_v44 = vld [vmem:[%s2034_s13 + $0x8] sm:$0xff]  ;;  %v280_v48 = vld [vmem:[%s2034_s13 + $0x10] sm:$0xff]  ;;  %v281_v52 = vld [vmem:[%s2034_s13 + $0x18] sm:$0xff] }
  0x1b   : > { %v283_v45 = vld [vmem:[%s2034_s13 + $0x28] sm:$0xff]  ;;  %v284_v49 = vld [vmem:[%s2034_s13 + $0x30] sm:$0xff]  ;;  %v289_v53 = vld [vmem:[%s2034_s13 + $0x58] sm:$0xff] }
  0x1c   : > { %v287_v46 = vld [vmem:[%s2034_s13 + $0x48] sm:$0xff]  ;;  %v288_v50 = vld [vmem:[%s2034_s13 + $0x50] sm:$0xff]  ;;  %v293_v54 = vld [vmem:[%s2034_s13 + $0x78] sm:$0xff] }
  0x1d   : > { %v291_v47 = vld [vmem:[%s2034_s13 + $0x68] sm:$0xff]  ;;  %v292_v51 = vld [vmem:[%s2034_s13 + $0x70] sm:$0xff]  ;;  %v285_v55 = vld [vmem:[%s2034_s13 + $0x38] sm:$0xff] }
  0x1e   : > { %v294_v56 = vld [vmem:[%s2034_s13 + $0x80] sm:$0xff]  ;;  %v295_v59 = vld [vmem:[%s2034_s13 + $0x88] sm:$0xff]  ;;  %v296_v63 = vld [vmem:[%s2034_s13 + $0x90] sm:$0xff] }
  0x1f   : > { %v302_v57 = vld [vmem:[%s2034_s13 + $0xc0] sm:$0xff]  ;;  %v303_v61 = vld [vmem:[%s2034_s13 + $0xc8] sm:$0xff]  ;;  %v304_v1 = vld [vmem:[%s2034_s13 + $0xd0] sm:$0xff] }
  0x20   : > { %1734 = vmatmul.msk.f32.gmra.mxu0 %vm318_vm0, %v248_v16  ;;  %1738 = vmatmul.msk.f32.gmra.mxu1 %vm318_vm0, %v252_v17  ;;  %v306_v58 = vld [vmem:[%s2034_s13 + $0xe0] sm:$0xff]  ;;  %v307_v62 = vld [vmem:[%s2034_s13 + $0xe8] sm:$0xff]  ;;  %v308_v2 = vld [vmem:[%s2034_s13 + $0xf0] sm:$0xff] }
  0x21   : > { %1742 = vmatmul.msk.f32.gmra.mxu2 %vm318_vm0, %v256_v18  ;;  %v298_v60 = vld [vmem:[%s2034_s13 + $0xa0] sm:$0xff]  ;;  %v299_v0 = vld [vmem:[%s2034_s13 + $0xa8] sm:$0xff]  ;;  %v297_v3 = vld [vmem:[%s2034_s13 + $0x98] sm:$0xff] }
  0x22   : > { %1746 = vmatmul.msk.f32.gmra.mxu3 %vm318_vm0, %v260_v19  ;;  %v301_v9 = vld [vmem:[%s2034_s13 + $0xb8] sm:$0xff] }
  0x28   : > { %1735 = vmatmul.msk.f32.gmra.mxu0 %vm318_vm0, %v249_v20  ;;  %1739 = vmatmul.msk.f32.gmra.mxu1 %vm318_vm0, %v253_v21 }
  0x29   : > { %1743 = vmatmul.msk.f32.gmra.mxu2 %vm318_vm0, %v257_v22  ;;  %v238_v22 = vld [vmem:[%s2106_s19] sm:$0xff] }
  0x2a   : > { %1747 = vmatmul.msk.f32.gmra.mxu3 %vm318_vm0, %v261_v23  ;;  %v239_v23 = vld [vmem:[%s2106_s19 + $0x8] sm:$0xff] }
  0x30   : > { %1748 = vmatmul.msk.f32.vlgmr.msrb.gmra.mxu0 %vm318_vm0, %v262_v24  ;;  %1752 = vmatmul.msk.f32.vlgmr.msrb.gmra.mxu1 %vm318_vm0, %v266_v25 }
  0x31   : > { %1756 = vmatmul.msk.f32.vlgmr.msrb.gmra.mxu2 %vm318_vm0, %v270_v26  ;;  %838 = vmatpush.msrb.mxu0 %v314_v6  ;;  %v309_v6 = vld [vmem:[%s2034_s13 + $0xf8] sm:$0xff] }
  0x32   : > { %1760 = vmatmul.msk.f32.vlgmr.msrb.gmra.mxu3 %vm318_vm0, %v274_v27  ;;  %920 = vmatpush.msrb.mxu2 %v316_v4  ;;  %v300_v4 = vld [vmem:[%s2034_s13 + $0xb0] sm:$0xff] }
  0x33   : > { %961 = vmatpush.msrb.mxu3 %v317_v5  ;;  %879 = vmatpush.msrb.mxu1 %v315_v7  ;;  %v305_v5 = vld [vmem:[%s2034_s13 + $0xd8] sm:$0xff] }
  0x38   : > { %1749 = vmatmul.msk.f32.gmra.mxu0 %vm318_vm0, %v263_v28  ;;  %1753 = vmatmul.msk.f32.gmra.mxu1 %vm318_vm0, %v267_v29  ;;  %v240_v28 = vld [vmem:[%s2106_s19 + $0x10] sm:$0xff]  ;;  %v241_v29 = vld [vmem:[%s2106_s19 + $0x18] sm:$0xff] }
  0x39   : > { %1757 = vmatmul.msk.f32.gmra.mxu2 %vm318_vm0, %v271_v30 }
  0x3a   : > { %1761 = vmatmul.msk.f32.gmra.mxu3 %vm318_vm0, %v275_v31 }
  0x40   : > { %1750 = vmatmul.msk.f32.gmra.mxu0 %vm318_vm0, %v264_v32  ;;  %1754 = vmatmul.msk.f32.gmra.mxu1 %vm318_vm0, %v268_v33 }
  0x41   : > { %1758 = vmatmul.msk.f32.gmra.mxu2 %vm318_vm0, %v272_v34 }
  0x42   : > { %1762 = vmatmul.msk.f32.gmra.mxu3 %vm318_vm0, %v276_v35 }
  0x48   : > { %1751 = vmatmul.msk.f32.gmra.mxu0 %vm318_vm0, %v265_v36  ;;  %1755 = vmatmul.msk.f32.gmra.mxu1 %vm318_vm0, %v269_v37 }
  0x49   : > { %1759 = vmatmul.msk.f32.gmra.mxu2 %vm318_vm0, %v273_v38 }
  0x4a   : > { %1763 = vmatmul.msk.f32.gmra.mxu3 %vm318_vm0, %v277_v39 }
  0x50   : > { %1764 = vmatmul.msk.f32.vlgmr.msra.gmra.mxu0 %vm318_vm0, %v278_v40  ;;  %1768 = vmatmul.msk.f32.vlgmr.msra.gmra.mxu1 %vm318_vm0, %v282_v41 }
  0x51   : > { %1772 = vmatmul.msk.f32.vlgmr.msra.gmra.mxu2 %vm318_vm0, %v286_v42  ;;  %v242_v42 = vld [vmem:[%s2106_s19 + $0x20] sm:$0xff] }
  0x52   : > { %1776 = vmatmul.msk.f32.vlgmr.msra.gmra.mxu3 %vm318_vm0, %v290_v43  ;;  %v243_v43 = vld [vmem:[%s2106_s19 + $0x28] sm:$0xff] }
  0x58   : > { %1765 = vmatmul.msk.f32.gmra.mxu0 %vm318_vm0, %v279_v44  ;;  %1769 = vmatmul.msk.f32.gmra.mxu1 %vm318_vm0, %v283_v45 }
  0x59   : > { %1773 = vmatmul.msk.f32.gmra.mxu2 %vm318_vm0, %v287_v46 }
  0x5a   : > { %1777 = vmatmul.msk.f32.gmra.mxu3 %vm318_vm0, %v291_v47 }
  0x60   : > { %1766 = vmatmul.msk.f32.gmra.mxu0 %vm318_vm0, %v280_v48  ;;  %1770 = vmatmul.msk.f32.gmra.mxu1 %vm318_vm0, %v284_v49  ;;  %v244_v48 = vld [vmem:[%s2106_s19 + $0x30] sm:$0xff]  ;;  %v245_v49 = vld [vmem:[%s2106_s19 + $0x38] sm:$0xff] }
  0x61   : > { %1774 = vmatmul.msk.f32.gmra.mxu2 %vm318_vm0, %v288_v50 }
  0x62   : > { %1778 = vmatmul.msk.f32.gmra.mxu3 %vm318_vm0, %v292_v51 }
  0x68   : > { %1767 = vmatmul.msk.f32.gmra.mxu0 %vm318_vm0, %v281_v52  ;;  %1771 = vmatmul.msk.f32.gmra.mxu1 %vm318_vm0, %v285_v55 }
  0x69   : > { %1775 = vmatmul.msk.f32.gmra.mxu2 %vm318_vm0, %v289_v53 }
  0x6a   : > { %1779 = vmatmul.msk.f32.gmra.mxu3 %vm318_vm0, %v293_v54 }
  0x70   : > { %1780 = vmatmul.msk.f32.vlgmr.msrb.gmra.mxu0 %vm318_vm0, %v294_v56  ;;  %1784 = vmatmul.msk.f32.vlgmr.msrb.gmra.mxu1 %vm318_vm0, %v298_v60 }
  0x71   : > { %1788 = vmatmul.msk.f32.vlgmr.msrb.gmra.mxu2 %vm318_vm0, %v302_v57 }
  0x72   : > { %1792 = vmatmul.msk.f32.vlgmr.msrb.gmra.mxu3 %vm318_vm0, %v306_v58 }
  0x78   : > { %1781 = vmatmul.msk.f32.gmra.mxu0 %vm318_vm0, %v295_v59  ;;  %1785 = vmatmul.msk.f32.gmra.mxu1 %vm318_vm0, %v299_v0 }
  0x79   : > { %1789 = vmatmul.msk.f32.gmra.mxu2 %vm318_vm0, %v303_v61 }
  0x7a   : > { %1793 = vmatmul.msk.f32.gmra.mxu3 %vm318_vm0, %v307_v62 }
  0x80   : > { %1782 = vmatmul.msk.f32.gmra.mxu0 %vm318_vm0, %v296_v63  ;;  %1786 = vmatmul.msk.f32.gmra.mxu1 %vm318_vm0, %v300_v4 }
  0x81   : > { %1790 = vmatmul.msk.f32.gmra.mxu2 %vm318_vm0, %v304_v1 }
  0x82   : > { %1794 = vmatmul.msk.f32.gmra.mxu3 %vm318_vm0, %v308_v2 }
  0x88   : > { %1783 = vmatmul.msk.f32.gmra.mxu0 %vm318_vm0, %v297_v3  ;;  %1787 = vmatmul.msk.f32.gmra.mxu1 %vm318_vm0, %v301_v9 }
  0x89   : > { %1791 = vmatmul.msk.f32.gmra.mxu2 %vm318_vm0, %v305_v5 }
  0x8a   : > { %1795 = vmatmul.msk.f32.gmra.mxu3 %vm318_vm0, %v309_v6 }
  0x8d   : > { %v348_v7 = vpop.f32.mrf.mxu0  ;;  %v389_v8 = vpop.f32.mrf.mxu1 }
  0x94   : > { %v430_v10 = vpop.f32.mrf.mxu2 }
  0x95   : > { %v471_v11 = vpop.f32.mrf.mxu3  ;;  %v351_v12 = vpop.f32.mrf.mxu0 }
  0x96   : > { %v392_v13 = vpop.f32.mrf.mxu1 }
  0x9c   : > { %v433_v14 = vpop.f32.mrf.mxu2 }
  0x9d   : > { %v474_v15 = vpop.f32.mrf.mxu3  ;;  %v354_v16 = vpop.f32.mrf.mxu0 }
  0x9e   : > { %v395_v17 = vpop.f32.mrf.mxu1 }
  0xa4   : > { %v436_v18 = vpop.f32.mrf.mxu2 }
  0xa5   : > { %v477_v19 = vpop.f32.mrf.mxu3  ;;  %v357_v20 = vpop.f32.mrf.mxu0 }
  0xa6   : > { %v398_v21 = vpop.f32.mrf.mxu1  ;;  %991 = vmatpush.msra.mxu0 %v357_v20 }
  0xa7   : > { %1014 = vmatpush.msra.mxu1 %v398_v21 }
  0xa8   : > { %992 = vmatpush.msra.mxu0 %v354_v16 }
  0xa9   : > { %1015 = vmatpush.msra.mxu1 %v395_v17 }
  0xaa   : > { %993 = vmatpush.msra.mxu0 %v351_v12 }
  0xab   : > { %1016 = vmatpush.msra.mxu1 %v392_v13 }
  0xac   : > { %v439_v24 = vpop.f32.mrf.mxu2  ;;  %994 = vmatpush.msra.mxu0 %v348_v7 }
  0xad   : > { %v480_v25 = vpop.f32.mrf.mxu3  ;;  %1017 = vmatpush.msra.mxu1 %v389_v8  ;;  %1037 = vmatpush.msra.mxu2 %v439_v24  ;;  %v512_v26 = vpop.f32.mrf.mxu0 }
  0xae   : > { %1060 = vmatpush.msra.mxu3 %v480_v25  ;;  %v553_v27 = vpop.f32.mrf.mxu1  ;;  %1796 = vmatmul.msk.f32.vlgmr.msra.gmra.mxu0 %vm975_vm1, %v238_v22 }
  0xaf   : > { %1797 = vmatmul.msk.f32.vlgmr.msra.gmra.mxu1 %vm975_vm1, %v239_v23  ;;  %1038 = vmatpush.msra.mxu2 %v436_v18 }
  0xb0   : > { %1061 = vmatpush.msra.mxu3 %v477_v19 }
  0xb1   : > { %1039 = vmatpush.msra.mxu2 %v433_v14 }
  0xb2   : > { %1062 = vmatpush.msra.mxu3 %v474_v15 }
  0xb3   : > { %1040 = vmatpush.msra.mxu2 %v430_v10 }
  0xb4   : > { %1063 = vmatpush.msra.mxu3 %v471_v11  ;;  %v594_v30 = vpop.f32.mrf.mxu2  ;;  %1798 = vmatmul.msk.f32.vlgmr.msra.gmra.mxu2 %vm975_vm1, %v240_v28 }
  0xb5   : > { %v635_v31 = vpop.f32.mrf.mxu3  ;;  %1799 = vmatmul.msk.f32.vlgmr.msra.gmra.mxu3 %vm975_vm1, %v241_v29  ;;  %v515_v32 = vpop.f32.mrf.mxu0 }
  0xb6   : > { %v556_v33 = vpop.f32.mrf.mxu1 }
  0xbc   : > { %v597_v34 = vpop.f32.mrf.mxu2 }
  0xbd   : > { %v638_v35 = vpop.f32.mrf.mxu3  ;;  %v518_v36 = vpop.f32.mrf.mxu0 }
  0xbe   : > { %v559_v37 = vpop.f32.mrf.mxu1 }
  0xc4   : > { %v600_v38 = vpop.f32.mrf.mxu2 }
  0xc5   : > { %v641_v39 = vpop.f32.mrf.mxu3  ;;  %v521_v40 = vpop.f32.mrf.mxu0 }
  0xc6   : > { %v562_v41 = vpop.f32.mrf.mxu1  ;;  %1083 = vmatpush.msrb.mxu0 %v521_v40 }
  0xc7   : > { %1106 = vmatpush.msrb.mxu1 %v562_v41 }
  0xc8   : > { %1084 = vmatpush.msrb.mxu0 %v518_v36 }
  0xc9   : > { %1107 = vmatpush.msrb.mxu1 %v559_v37 }
  0xca   : > { %1085 = vmatpush.msrb.mxu0 %v515_v32 }
  0xcb   : > { %1108 = vmatpush.msrb.mxu1 %v556_v33 }
  0xcc   : > { %v603_v44 = vpop.f32.mrf.mxu2  ;;  %1086 = vmatpush.msrb.mxu0 %v512_v26 }
  0xcd   : > { %v644_v45 = vpop.f32.mrf.mxu3  ;;  %1109 = vmatpush.msrb.mxu1 %v553_v27  ;;  %1129 = vmatpush.msrb.mxu2 %v603_v44  ;;  %v676_v46 = vpop.f32.mrf.mxu0 }
  0xce   : > { %1152 = vmatpush.msrb.mxu3 %v644_v45  ;;  %v717_v47 = vpop.f32.mrf.mxu1  ;;  %1800 = vmatmul.msk.f32.vlgmr.msrb.gmra.mxu0 %vm975_vm1, %v242_v42 }
  0xcf   : > { %1801 = vmatmul.msk.f32.vlgmr.msrb.gmra.mxu1 %vm975_vm1, %v243_v43  ;;  %1130 = vmatpush.msrb.mxu2 %v600_v38 }
  0xd0   : > { %1153 = vmatpush.msrb.mxu3 %v641_v39 }
  0xd1   : > { %1131 = vmatpush.msrb.mxu2 %v597_v34 }
  0xd2   : > { %1154 = vmatpush.msrb.mxu3 %v638_v35 }
  0xd3   : > { %1132 = vmatpush.msrb.mxu2 %v594_v30 }
  0xd4   : > { %1155 = vmatpush.msrb.mxu3 %v635_v31  ;;  %1802 = vmatmul.msk.f32.vlgmr.msrb.gmra.mxu2 %vm975_vm1, %v244_v48  ;;  %v758_v50 = vpop.f32.mrf.mxu2 }
  0xd5   : > { %1803 = vmatmul.msk.f32.vlgmr.msrb.gmra.mxu3 %vm975_vm1, %v245_v49  ;;  %v799_v51 = vpop.f32.mrf.mxu3  ;;  %v679_v52 = vpop.f32.mrf.mxu0 }
  0xd6   : > { %v720_v53 = vpop.f32.mrf.mxu1 }
  0xdc   : > { %v761_v54 = vpop.f32.mrf.mxu2 }
  0xdd   : > { %v802_v55 = vpop.f32.mrf.mxu3  ;;  %v682_v56 = vpop.f32.mrf.mxu0 }
  0xde   : > { %v723_v57 = vpop.f32.mrf.mxu1 }
  0xe4   : > { %v764_v58 = vpop.f32.mrf.mxu2 }
  0xe5   : > { %v805_v59 = vpop.f32.mrf.mxu3  ;;  %v685_v60 = vpop.f32.mrf.mxu0 }
  0xe6   : > { %1804 = vmatpush.xpose.msk.msra.mxu0 %vm318_vm0, %v685_v60  ;;  %v726_v61 = vpop.f32.mrf.mxu1 }
  0xe7   : > { %1809 = vmatpush.xpose.msk.msra.mxu1 %vm318_vm0, %v726_v61 }
  0xea   : > { %1805 = vmatpush.xpose.msk.msra.mxu0 %vm318_vm0, %v682_v56 }
  0xeb   : > { %1810 = vmatpush.xpose.msk.msra.mxu1 %vm318_vm0, %v723_v57 }
  0xec   : > { %v767_v62 = vpop.f32.mrf.mxu2 }
  0xed   : > { %v808_v63 = vpop.f32.mrf.mxu3  ;;  %1814 = vmatpush.xpose.msk.msra.mxu2 %vm318_vm0, %v767_v62  ;;  %v840_v0 = vpop.f32.mrf.mxu0 }
  0xee   : > { %1819 = vmatpush.xpose.msk.msra.mxu3 %vm318_vm0, %v808_v63  ;;  %1806 = vmatpush.xpose.msk.msra.mxu0 %vm318_vm0, %v679_v52  ;;  %v881_v1 = vpop.f32.mrf.mxu1 }
  0xef   : > { %1811 = vmatpush.xpose.msk.msra.mxu1 %vm318_vm0, %v720_v53 }
  0xf1   : > { %1815 = vmatpush.xpose.msk.msra.mxu2 %vm318_vm0, %v764_v58 }
  0xf2   : > { %1820 = vmatpush.xpose.msk.msra.mxu3 %vm318_vm0, %v805_v59  ;;  %1807 = vmatpush.xpose.msk.msra.mxu0 %vm318_vm0, %v676_v46 }
  0xf3   : > { %1812 = vmatpush.xpose.msk.msra.mxu1 %vm318_vm0, %v717_v47 }
  0xf4   : > { %v922_v2 = vpop.f32.mrf.mxu2 }
  0xf5   : > { %v963_v3 = vpop.f32.mrf.mxu3  ;;  %1816 = vmatpush.xpose.msk.msra.mxu2 %vm318_vm0, %v761_v54  ;;  %v843_v4 = vpop.f32.mrf.mxu0 }
  0xf6   : > { %1821 = vmatpush.xpose.msk.msra.mxu3 %vm318_vm0, %v802_v55  ;;  %v884_v5 = vpop.f32.mrf.mxu1 }
  0xf9   : > { %1817 = vmatpush.xpose.msk.msra.mxu2 %vm318_vm0, %v758_v50 }
  0xfa   : > { %1822 = vmatpush.xpose.msk.msra.mxu3 %vm318_vm0, %v799_v51 }
  0xfc   : > { %v925_v6 = vpop.f32.mrf.mxu2 }
  0xfd   : > { %v966_v7 = vpop.f32.mrf.mxu3  ;;  %v846_v8 = vpop.f32.mrf.mxu0 }
  0xfe   : > { %v887_v9 = vpop.f32.mrf.mxu1 }
 0x104   : > { %v928_v10 = vpop.f32.mrf.mxu2 }
 0x105   : > { %v969_v11 = vpop.f32.mrf.mxu3  ;;  %v849_v12 = vpop.f32.mrf.mxu0 }
 0x106   : > { %1824 = vmatpush.xpose.msk.msrb.mxu0 %vm318_vm0, %v849_v12  ;;  %v890_v13 = vpop.f32.mrf.mxu1 }
 0x107   : > { %1829 = vmatpush.xpose.msk.msrb.mxu1 %vm318_vm0, %v890_v13 }
 0x10a   : > { %1825 = vmatpush.xpose.msk.msrb.mxu0 %vm318_vm0, %v846_v8 }
 0x10b   : > { %1830 = vmatpush.xpose.msk.msrb.mxu1 %vm318_vm0, %v887_v9 }
 0x10c   : > { %v931_v14 = vpop.f32.mrf.mxu2 }
 0x10d   : > { %v972_v15 = vpop.f32.mrf.mxu3  ;;  %1834 = vmatpush.xpose.msk.msrb.mxu2 %vm318_vm0, %v931_v14 }
 0x10e   : > { %1839 = vmatpush.xpose.msk.msrb.mxu3 %vm318_vm0, %v972_v15  ;;  %1826 = vmatpush.xpose.msk.msrb.mxu0 %vm318_vm0, %v843_v4 }
 0x10f   : > { %1831 = vmatpush.xpose.msk.msrb.mxu1 %vm318_vm0, %v884_v5 }
 0x111   : > { %1835 = vmatpush.xpose.msk.msrb.mxu2 %vm318_vm0, %v928_v10 }
 0x112   : > { %1840 = vmatpush.xpose.msk.msrb.mxu3 %vm318_vm0, %v969_v11  ;;  %1827 = vmatpush.xpose.msk.msrb.mxu0 %vm318_vm0, %v840_v0 }
 0x113   : > { %1832 = vmatpush.xpose.msk.msrb.mxu1 %vm318_vm0, %v881_v1 }
 0x115   : > { %1836 = vmatpush.xpose.msk.msrb.mxu2 %vm318_vm0, %v925_v6 }
 0x116   : > { %1841 = vmatpush.xpose.msk.msrb.mxu3 %vm318_vm0, %v966_v7 }
 0x119   : > { %1837 = vmatpush.xpose.msk.msrb.mxu2 %vm318_vm0, %v922_v2 }
 0x11a   : > { %1842 = vmatpush.xpose.msk.msrb.mxu3 %vm318_vm0, %v963_v3 }
 0x12b   : > { %v996_v16 = vpop.f32.mrf.mxu0 }
 0x12c   : > { %v1160_v17 = vsel %vm318_vm0, %v996_v16, -inf  ;;  %v1019_v18 = vpop.f32.mrf.mxu1 }
 0x12d   : > { %1161 = vmax.xlane.f32.xlu1 %v1160_v17  ;;  %v1163_v19 = vsel %vm318_vm0, %v1019_v18, -inf }
 0x135   : > { %1164 = vmax.xlane.f32.xlu1 %v1163_v19 }
 0x137   : > { %v1042_v20 = vpop.f32.mrf.mxu2 }
 0x138   : > { %v1166_v21 = vsel %vm318_vm0, %v1042_v20, -inf  ;;  %v1065_v22 = vpop.f32.mrf.mxu3 }
 0x139   : > { %1167 = vmax.xlane.f32.xlu0 %v1166_v21  ;;  %v1169_v23 = vsel %vm318_vm0, %v1065_v22, -inf }
 0x141   : > { %1170 = vmax.xlane.f32.xlu0 %v1169_v23 }
 0x14b   : > { %v1088_v24 = vpop.f32.mrf.mxu0 }
 0x14c   : > { %v1111_v25 = vpop.f32.mrf.mxu1  ;;  %v1172_v27 = vsel %vm318_vm0, %v1088_v24, -inf }
 0x14d   : > { %v1175_v26 = vsel %vm318_vm0, %v1111_v25, -inf  ;;  %1173 = vmax.xlane.f32.xlu0 %v1172_v27 }
 0x14e   : > { %1176 = vmax.xlane.f32.xlu1 %v1175_v26 }
 0x157   : > { %v1134_v28 = vpop.f32.mrf.mxu2 }
 0x158   : > { %v1178_v29 = vsel %vm318_vm0, %v1134_v28, -inf  ;;  %v1157_v30 = vpop.f32.mrf.mxu3 }
 0x159   : > { %1179 = vmax.xlane.f32.xlu2 %v1178_v29  ;;  %v1181_v31 = vsel %vm318_vm0, %v1157_v30, -inf }
 0x161   : > { %1182 = vmax.xlane.f32.xlu2 %v1181_v31 }
 0x1a0   : > { %v1162_v32 = vpop.xlane.xlu1 %1161 }
 0x1a1   : > { %v1184_v33 = vsub.f32 %v996_v16, %v1162_v32 }
 0x1a3   : > { %v1192_v34 = vmul.f32 1.442695, %v1184_v33 }
 0x1a5   : > { %1858 = vpow2.f32 %v1192_v34 }
 0x1a8   : > { %v1165_v36 = vpop.xlane.xlu1 %1164 }
 0x1a9   : > { %v1185_v40 = vsub.f32 %v1019_v18, %v1165_v36 }
 0x1ab   : > { %v2164_v35 = vpop.eup %1858  ;;  %v1194_v42 = vmul.f32 1.442695, %v1185_v40 }
 0x1ac   : > { %v1168_v37 = vpop.xlane.xlu0 %1167  ;;  %v1208_v38 = vsel %vm318_vm0, %v2164_v35, 0.0 }
 0x1ad   : > { %v1186_v39 = vsub.f32 %v1042_v20, %v1168_v37  ;;  %1209 = vadd.xlane.f32.xlu1 %v1208_v38 }
 0x1af   : > { %v1196_v41 = vmul.f32 1.442695, %v1186_v39 }
 0x1b1   : > { %1860 = vpow2.f32 %v1196_v41 }
 0x1b2   : > { %1862 = vpow2.f32 %v1194_v42 }
 0x1b4   : > { %v1171_v43 = vpop.xlane.xlu0 %1170 }
 0x1b5   : > { %v1187_v44 = vsub.f32 %v1065_v22, %v1171_v43 }
 0x1b7   : > { %v2168_v45 = vpop.eup %1860  ;;  %v1198_v46 = vmul.f32 1.442695, %v1187_v44 }
 0x1b8   : > { %v1214_v47 = vsel %vm318_vm0, %v2168_v45, 0.0  ;;  %v2172_v48 = vpop.eup %1862 }
 0x1b9   : > { %1864 = vpow2.f32 %v1198_v46  ;;  %1215 = vadd.xlane.f32.xlu2 %v1214_v47  ;;  %v1211_v51 = vsel %vm318_vm0, %v2172_v48, 0.0 }
 0x1bf   : > { %v2174_v49 = vpop.eup %1864 }
 0x1c0   : > { %v1174_v50 = vpop.xlane.xlu0 %1173  ;;  %v1217_v52 = vsel %vm318_vm0, %v2174_v49, 0.0 }
 0x1c1   : > { %v1188_v53 = vsub.f32 %v1088_v24, %v1174_v50  ;;  %1212 = vadd.xlane.f32.xlu2 %v1211_v51  ;;  %1218 = vadd.xlane.f32.xlu0 %v1217_v52  ;;  %v1177_v56 = vpop.xlane.xlu1 %1176 }
 0x1c2   : > { %v1189_v60 = vsub.f32 %v1111_v25, %v1177_v56 }
 0x1c3   : > { %v1200_v54 = vmul.f32 1.442695, %v1188_v53 }
 0x1c4   : > { %v1202_v62 = vmul.f32 1.442695, %v1189_v60 }
 0x1c5   : > { %1866 = vpow2.f32 %v1200_v54 }
 0x1cb   : > { %v2180_v55 = vpop.eup %1866 }
 0x1cc   : > { %v1180_v57 = vpop.xlane.xlu2 %1179  ;;  %v1220_v59 = vsel %vm318_vm0, %v2180_v55, 0.0 }
 0x1cd   : > { %v1190_v58 = vsub.f32 %v1134_v28, %v1180_v57  ;;  %1221 = vadd.xlane.f32.xlu2 %v1220_v59 }
 0x1cf   : > { %v1204_v61 = vmul.f32 1.442695, %v1190_v58 }
 0x1d1   : > { %1868 = vpow2.f32 %v1204_v61 }
 0x1d2   : > { %1870 = vpow2.f32 %v1202_v62 }
 0x1d4   : > { %v1183_v63 = vpop.xlane.xlu2 %1182 }
 0x1d5   : > { %v1191_v0 = vsub.f32 %v1157_v30, %v1183_v63 }
 0x1d7   : > { %v2184_v1 = vpop.eup %1868  ;;  %v1206_v2 = vmul.f32 1.442695, %v1191_v0 }
 0x1d8   : > { %v1226_v3 = vsel %vm318_vm0, %v2184_v1, 0.0  ;;  %v2188_v4 = vpop.eup %1870 }
 0x1d9   : > { %1872 = vpow2.f32 %v1206_v2  ;;  %1227 = vadd.xlane.f32.xlu0 %v1226_v3  ;;  %v1223_v7 = vsel %vm318_vm0, %v2188_v4, 0.0 }
 0x1df   : > { %v2190_v5 = vpop.eup %1872 }
 0x1e0   : > { %v1229_v6 = vsel %vm318_vm0, %v2190_v5, 0.0 }
 0x1e1   : > { %1230 = vadd.xlane.f32.xlu1 %v1229_v6  ;;  %1224 = vadd.xlane.f32.xlu0 %v1223_v7 }
 0x220   : > { %v1210_v8 = vpop.xlane.xlu1 %1209 }
 0x221   : > { %1874 = vrcp.f32 %v1210_v8  ;;  %v1243_v12 = vand.u32 2147483648, %v1210_v8  ;;  %v1241_v14 = vand.u32 2147483647, %v1210_v8  ;;  %vm1237_vm3 = vweird.f32 %v1210_v8 }
 0x223   : > { %v1244_v17 = vor.u32 1.1754944e-38, %v1243_v12  ;;  %vm1242_vm5 = vcmp.eq.f32.partialorder %v1241_v14, 8.507059e+37 }
 0x227   : > { %v1875_v9 = vpop.eup %1874 }
 0x228   : > { %v1233_v10 = vmul.f32 %v1875_v9, %v1210_v8  ;;  %vm1238_vm2 = vweird.f32 %v1875_v9 }
 0x229   : > { %vm1239_vm4 = vmor %vm1237_vm3, %vm1238_vm2 }
 0x22a   : > { %v1234_v11 = vsub.f32 1.0, %v1233_v10 }
 0x22c   : > { %v1235_v13 = vmul.f32 %v1875_v9, %v1234_v11  ;;  %v1216_v15 = vpop.xlane.xlu2 %1215 }
 0x22d   : > { %1876 = vrcp.f32 %v1216_v15  ;;  %v1271_v26 = vand.u32 2147483648, %v1216_v15  ;;  %v1269_v28 = vand.u32 2147483647, %v1216_v15  ;;  %vm1265_vm7 = vweird.f32 %v1216_v15 }
 0x22e   : > { %v1236_v16 = vadd.f32 %v1875_v9, %v1235_v13 }
 0x22f   : > { %v1272_v31 = vor.u32 1.1754944e-38, %v1271_v26  ;;  %vm1270_vm9 = vcmp.eq.f32.partialorder %v1269_v28, 8.507059e+37 }
 0x230   : > { %v1240_v18 = vsel %vm1239_vm4, %v1875_v9, %v1236_v16 }
 0x231   : > { %v1245_v19 = vsel %vm1242_vm5, %v1244_v17, %v1240_v18 }
 0x232   : > { %v1344_v20 = vmul.f32 %v2164_v35, %v1245_v19 }
 0x233   : > { %v1877_v21 = vpop.eup %1876 }
 0x234   : > { %v1261_v22 = vmul.f32 %v1877_v21, %v1216_v15  ;;  %v1213_v23 = vpop.xlane.xlu2 %1212  ;;  %1808 = vmatmul.msk.f32.vlgmr.msra.gmra.mxu0 %vm318_vm0, %v1344_v20  ;;  %v1219_v24 = vpop.xlane.xlu0 %1218  ;;  %vm1266_vm6 = vweird.f32 %v1877_v21 }
 0x235   : > { %1878 = vrcp.f32 %v1213_v23  ;;  %vm1267_vm8 = vmor %vm1265_vm7, %vm1266_vm6  ;;  %v1257_v39 = vand.u32 2147483648, %v1213_v23  ;;  %v1255_v42 = vand.u32 2147483647, %v1213_v23  ;;  %v1285_v43 = vand.u32 2147483648, %v1219_v24 }
 0x236   : > { %v1262_v25 = vsub.f32 1.0, %v1261_v22  ;;  %1880 = vrcp.f32 %v1219_v24  ;;  %v1283_v46 = vand.u32 2147483647, %v1219_v24  ;;  %vm1251_vm12 = vweird.f32 %v1213_v23 }
 0x237   : > { %v1258_v51 = vor.u32 1.1754944e-38, %v1257_v39  ;;  %vm1279_vm14 = vweird.f32 %v1219_v24  ;;  %vm1256_vm15 = vcmp.eq.f32.partialorder %v1255_v42, 8.507059e+37  ;;  %v1286_v53 = vor.u32 1.1754944e-38, %v1285_v43 }
 0x238   : > { %v1263_v27 = vmul.f32 %v1877_v21, %v1262_v25  ;;  %vm1284_vm3 = vcmp.eq.f32.partialorder %v1283_v46, 8.507059e+37 }
 0x23a   : > { %v1264_v29 = vadd.f32 %v1877_v21, %v1263_v27 }
 0x23b   : > { %v1879_v30 = vpop.eup %1878 }
 0x23c   : > { %v1881_v32 = vpop.eup %1880  ;;  %v1268_v33 = vsel %vm1267_vm8, %v1877_v21, %v1264_v29  ;;  %v1247_v34 = vmul.f32 %v1879_v30, %v1213_v23  ;;  %vm1252_vm10 = vweird.f32 %v1879_v30 }
 0x23d   : > { %v1273_v35 = vsel %vm1270_vm9, %v1272_v31, %v1268_v33  ;;  %v1275_v36 = vmul.f32 %v1881_v32, %v1219_v24  ;;  %vm1280_vm11 = vweird.f32 %v1881_v32  ;;  %vm1253_vm13 = vmor %vm1251_vm12, %vm1252_vm10 }
 0x23e   : > { %v1248_v37 = vsub.f32 1.0, %v1247_v34  ;;  %v1346_v38 = vmul.f32 %v2168_v45, %v1273_v35  ;;  %vm1281_vm2 = vmor %vm1279_vm14, %vm1280_vm11 }
 0x23f   : > { %v1276_v40 = vsub.f32 1.0, %v1275_v36 }
 0x240   : > { %v1249_v41 = vmul.f32 %v1879_v30, %v1248_v37  ;;  %1818 = vmatmul.msk.f32.vlgmr.msra.gmra.mxu2 %vm318_vm0, %v1346_v38  ;;  %v1222_v47 = vpop.xlane.xlu2 %1221 }
 0x241   : > { %v1277_v44 = vmul.f32 %v1881_v32, %v1276_v40  ;;  %1882 = vrcp.f32 %v1222_v47  ;;  %v1299_v63 = vand.u32 2147483648, %v1222_v47  ;;  %v1297_v3 = vand.u32 2147483647, %v1222_v47 }
 0x242   : > { %v1250_v50 = vadd.f32 %v1879_v30, %v1249_v41  ;;  %vm1293_vm5 = vweird.f32 %v1222_v47 }
 0x243   : > { %v1278_v52 = vadd.f32 %v1881_v32, %v1277_v44  ;;  %v1300_v7 = vor.u32 1.1754944e-38, %v1299_v63  ;;  %vm1298_vm7 = vcmp.eq.f32.partialorder %v1297_v3, 8.507059e+37 }
 0x244   : > { %v1254_v45 = vsel %vm1253_vm13, %v1879_v30, %v1250_v50 }
 0x245   : > { %v1259_v54 = vsel %vm1256_vm15, %v1258_v51, %v1254_v45  ;;  %v1282_v56 = vsel %vm1281_vm2, %v1881_v32, %v1278_v52 }
 0x246   : > { %v1287_v57 = vsel %vm1284_vm3, %v1286_v53, %v1282_v56  ;;  %v1345_v58 = vmul.f32 %v2172_v48, %v1259_v54 }
 0x247   : > { %v1347_v59 = vmul.f32 %v2174_v49, %v1287_v57  ;;  %v1883_v60 = vpop.eup %1882 }
 0x248   : > { %1813 = vmatmul.msk.f32.vlgmr.msra.gmra.mxu1 %vm318_vm0, %v1345_v58  ;;  %v1289_v61 = vmul.f32 %v1883_v60, %v1222_v47  ;;  %vm1294_vm4 = vweird.f32 %v1883_v60 }
 0x249   : > { %1823 = vmatmul.msk.f32.vlgmr.msra.gmra.mxu3 %vm318_vm0, %v1347_v59  ;;  %vm1295_vm6 = vmor %vm1293_vm5, %vm1294_vm4 }
 0x24a   : > { %v1290_v62 = vsub.f32 1.0, %v1289_v61 }
 0x24c   : > { %v1228_v0 = vpop.xlane.xlu0 %1227  ;;  %v1291_v2 = vmul.f32 %v1883_v60, %v1290_v62 }
 0x24d   : > { %1884 = vrcp.f32 %v1228_v0  ;;  %v1327_v14 = vand.u32 2147483648, %v1228_v0  ;;  %v1325_v16 = vand.u32 2147483647, %v1228_v0  ;;  %vm1321_vm9 = vweird.f32 %v1228_v0 }
 0x24e   : > { %v1292_v6 = vadd.f32 %v1883_v60, %v1291_v2 }
 0x24f   : > { %v1328_v19 = vor.u32 1.1754944e-38, %v1327_v14  ;;  %vm1326_vm11 = vcmp.eq.f32.partialorder %v1325_v16, 8.507059e+37 }
 0x250   : > { %v1296_v48 = vsel %vm1295_vm6, %v1883_v60, %v1292_v6 }
 0x251   : > { %v1301_v49 = vsel %vm1298_vm7, %v1300_v7, %v1296_v48 }
 0x252   : > { %v1348_v9 = vmul.f32 %v2180_v55, %v1301_v49 }
 0x253   : > { %v1885_v8 = vpop.eup %1884 }
 0x254   : > { %v1317_v10 = vmul.f32 %v1885_v8, %v1228_v0  ;;  %v1231_v11 = vpop.xlane.xlu1 %1230  ;;  %v1225_v12 = vpop.xlane.xlu0 %1224  ;;  %1828 = vmatmul.msk.f32.vlgmr.msrb.gmra.mxu0 %vm318_vm0, %v1348_v9  ;;  %vm1322_vm8 = vweird.f32 %v1885_v8 }
 0x255   : > { %1886 = vrcp.f32 %v1231_v11  ;;  %vm1323_vm10 = vmor %vm1321_vm9, %vm1322_vm8  ;;  %v1341_v26 = vand.u32 2147483648, %v1231_v11  ;;  %v1339_v29 = vand.u32 2147483647, %v1231_v11  ;;  %v1313_v30 = vand.u32 2147483648, %v1225_v12 }
 0x256   : > { %v1318_v13 = vsub.f32 1.0, %v1317_v10  ;;  %1888 = vrcp.f32 %v1225_v12  ;;  %v1311_v32 = vand.u32 2147483647, %v1225_v12  ;;  %vm1335_vm14 = vweird.f32 %v1231_v11 }
 0x257   : > { %v1342_v34 = vor.u32 1.1754944e-38, %v1341_v26  ;;  %vm1307_vm2 = vweird.f32 %v1225_v12  ;;  %vm1340_vm3 = vcmp.eq.f32.partialorder %v1339_v29, 8.507059e+37 }
 0x258   : > { %v1319_v15 = vmul.f32 %v1885_v8, %v1318_v13  ;;  %vm1312_vm5 = vcmp.eq.f32.partialorder %v1311_v32, 8.507059e+37 }
 0x25a   : > { %v1320_v17 = vadd.f32 %v1885_v8, %v1319_v15 }
 0x25b   : > { %v1887_v18 = vpop.eup %1886 }
 0x25c   : > { %v1889_v20 = vpop.eup %1888  ;;  %v1324_v21 = vsel %vm1323_vm10, %v1885_v8, %v1320_v17  ;;  %v1331_v55 = vmul.f32 %v1887_v18, %v1231_v11  ;;  %vm1336_vm12 = vweird.f32 %v1887_v18 }
 0x25d   : > { %v1329_v22 = vsel %vm1326_vm11, %v1328_v19, %v1324_v21  ;;  %v1303_v23 = vmul.f32 %v1889_v20, %v1225_v12  ;;  %vm1308_vm13 = vweird.f32 %v1889_v20  ;;  %vm1337_vm15 = vmor %vm1335_vm14, %vm1336_vm12 }
 0x25e   : > { %v1332_v24 = vsub.f32 1.0, %v1331_v55  ;;  %v1350_v25 = vmul.f32 %v2184_v1, %v1329_v22  ;;  %vm1309_vm4 = vmor %vm1307_vm2, %vm1308_vm13  ;;  %v1314_v1 = vor.u32 1.1754944e-38, %v1313_v30 }
 0x25f   : > { %v1304_v27 = vsub.f32 1.0, %v1303_v23 }
 0x260   : > { %v1333_v28 = vmul.f32 %v1887_v18, %v1332_v24  ;;  %1838 = vmatmul.msk.f32.vlgmr.msrb.gmra.mxu2 %vm318_vm0, %v1350_v25 }
 0x261   : > { %v1305_v31 = vmul.f32 %v1889_v20, %v1304_v27 }
 0x262   : > { %v1334_v33 = vadd.f32 %v1887_v18, %v1333_v28 }
 0x263   : > { %v1306_v35 = vadd.f32 %v1889_v20, %v1305_v31 }
 0x264   : > { %v1338_v36 = vsel %vm1337_vm15, %v1887_v18, %v1334_v33 }
 0x265   : > { %v1343_v37 = vsel %vm1340_vm3, %v1342_v34, %v1338_v36  ;;  %v1310_v38 = vsel %vm1309_vm4, %v1889_v20, %v1306_v35 }
 0x266   : > { %v1351_v39 = vmul.f32 %v2190_v5, %v1343_v37  ;;  %v1315_v40 = vsel %vm1312_vm5, %v1314_v1, %v1310_v38 }
 0x267   : > { %v1349_v41 = vmul.f32 %v2188_v4, %v1315_v40 }
 0x268   : > { %1843 = vmatmul.msk.f32.vlgmr.msrb.gmra.mxu3 %vm318_vm0, %v1351_v39 }
 0x269   : > { %1833 = vmatmul.msk.f32.vlgmr.msrb.gmra.mxu1 %vm318_vm0, %v1349_v41 }
 0x2b1   : > { %v1384_v42 = vpop.f32.mrf.mxu0 }
 0x2b2   : > { %1632 = vst.msk [vmem:[%s237_s22] sm:$0xff] %vm975_vm1, %v1384_v42 }
 0x2c3   : > { %v1454_v43 = vpop.f32.mrf.mxu2 }
 0x2c4   : > { %1634 = vst.msk [vmem:[%s237_s22 + $0x10] sm:$0xff] %vm975_vm1, %v1454_v43 }
 0x2c5   : > { %v1419_v44 = vpop.f32.mrf.mxu1 }
 0x2c6   : > { %1633 = vst.msk [vmem:[%s237_s22 + $0x8] sm:$0xff] %vm975_vm1, %v1419_v44 }
 0x2cc   : > { %v1489_v5 = vpop.f32.mrf.mxu3 }
 0x2cd   : > { %1635 = vst.msk [vmem:[%s237_s22 + $0x18] sm:$0xff] %vm975_vm1, %v1489_v5 }
 0x2d1   : > { %v1524_v4 = vpop.f32.mrf.mxu0 }
 0x2d2   : > { %1636 = vst.msk [vmem:[%s237_s22 + $0x20] sm:$0xff] %vm975_vm1, %v1524_v4 }
 0x2e3   : > { %v1594_v46 = vpop.f32.mrf.mxu2 }
 0x2e4   : > { %1638 = vst.msk [vmem:[%s237_s22 + $0x30] sm:$0xff] %vm975_vm1, %v1594_v46 }
 0x2e6   : > { %v1559_v47 = vpop.f32.mrf.mxu1 }
 0x2e7   : > { %1637 = vst.msk [vmem:[%s237_s22 + $0x28] sm:$0xff] %vm975_vm1, %v1559_v47 }
 0x2eb   : > { %v1629_v50 = vpop.f32.mrf.mxu3 }
 0x2ec   : > { %1639 = vst.msk [vmem:[%s237_s22 + $0x38] sm:$0xff] %vm975_vm1, %v1629_v50 }
 0x2ed PF: > { %s14_s15 = sadd.s32 1, %s1896_s15  }
 0x2ee   : > { %p11_p4 = scmp.ge.s32.totalorder %s14_s15, 4  }
 0x2f0   :  { %13 = sbr.rel (!%p11_p4) target bundleno = 1 (0x1), region = 72 }

</bundles_post_ra>
